<compile_context>
chip_gen: v7x
topology: tpu7x:2x2x1
jax: 0.10.0
libtpu: 0.0.40
codegen_flags: <defaults>
</compile_context>

<pallas_src>
import math

import jax
import jax.numpy as jnp
from jax.experimental import pallas as pl
from jax.experimental.pallas import tpu as pltpu

# ------------------------- configuration (small shapes) -------------------------
B = 2            # batch
L = 16           # c_in[0]  -> "l" axis, also head width n
H = 4            # c_in[1]  -> "h" axis, preconv input channels
V = 2            # "v" axis; preconv kernel (1, 2) consumes it exactly
HS = 8           # hs
C4 = 4 * HS      # hs * 4 = 32
NF = HS          # inception per-branch width = 8
KSS = (9, 5, 3)  # inception temporal kernel sizes
KMAX = KSS[0]    # 9
PAD = KMAX // 2  # 4
EPS = 1e-5

N = B * L                    # 32 activation rows (batch stacked on sublanes)
STACKW = KMAX * NF + C4      # 104 = im2col taps (72) + maxpool branch (32)
PROWS = 176                  # packed parameter slab rows (multiple of 8)
PLANES = 128                 # packed parameter slab lanes


# --------------------------------- Pallas kernel ---------------------------------
def hs_kernel(x_ref, p_ref, out_ref):
    f32 = jnp.float32

    # ---- unpack the single parameter slab (static slices, zero runtime cost) ----
    w_pre = p_ref[0:8, 0:C4]               # (8, 32)  preconv weight (* bn0 scale)
    b_pre = p_ref[0:1, 32:64]              # (1, 32)  preconv bias   (* bn0 scale)
    t1    = p_ref[0:1, 64:96]              # (1, 32)  block-1 BN shift
    t2    = p_ref[0:1, 96:128]             # (1, 32)  block-2 BN shift
    wb1   = p_ref[8:40, 0:NF]              # (32, 8)  block-1 bottleneck 1x1
    wb2   = p_ref[8:40, NF:2 * NF]         # (32, 8)  block-2 bottleneck 1x1
    w_fc  = p_ref[8:40, 16:17]             # (32, 1)  final Conv1d(C4, 1, 1) weight
    sel   = p_ref[8:40, 24:24 + B]         # (32, B)  collapsed-head row weights
    const = p_ref[8:9, 32:32 + B]          # (1, B)   folded conv/head biases
    wf1   = p_ref[40:144, 0:C4]            # (104, 32) block-1 fused conv+maxpool W
    wf2   = p_ref[40:144, C4:2 * C4]       # (104, 32) block-2 fused W
    mask  = p_ref[144:176, 0:STACKW]       # (32, 104) im2col batch-boundary mask

    # "row i-1 / i+1 is inside the same batch segment" (reuse delta=-1/+1 mask cols)
    mask_up = mask[:, 3 * NF:3 * NF + 1]   # (32, 1)
    mask_dn = mask[:, 5 * NF:5 * NF + 1]   # (32, 1)

    # hoisted zero rows for the temporal shifts
    zpad_nf = jnp.zeros((PAD, NF), f32)
    zpad_c4 = jnp.zeros((1, C4), f32)

    def shifted(v, d):
        # shifted(v, d)[i] = v[i + d], zero rows outside [0, N)
        if d == 0:
            return v
        if d > 0:
            return jnp.concatenate([v[d:, :], zpad_nf[:d, :]], axis=0)
        return jnp.concatenate([zpad_nf[:-d, :], v[:N + d, :]], axis=0)

    def inception(z, wb, wf, t):
        # bottleneck 1x1: (32, 32) @ (32, 8)
        bott = jnp.dot(z, wb, preferred_element_type=f32)
        # im2col shift stack covering the k=(9,5,3) convs in a shared 9-tap layout
        pieces = [shifted(bott, d) for d in range(-PAD, PAD + 1)]
        # MaxPool1d(3, stride=1, padding=1) branch on the block input (per batch)
        up = jnp.concatenate([zpad_c4, z[:N - 1, :]], axis=0)   # row i -> z[i-1]
        dn = jnp.concatenate([z[1:, :], zpad_c4], axis=0)       # row i -> z[i+1]
        mp = jnp.maximum(z, jnp.where(mask_up > 0.0, up, z))
        mp = jnp.maximum(mp, jnp.where(mask_dn > 0.0, dn, z))
        # one fused MXU matmul for all four branches (BN scale folded into wf)
        stack = jnp.concatenate(pieces + [mp], axis=1) * mask    # (32, 104)
        out = jnp.dot(stack, wf, preferred_element_type=f32) + t  # (32, 32)
        return jnp.maximum(out, 0.0)                             # BN shift + ReLU

    x = x_ref[...]                                               # (32, 8)
    # preconv Conv2d(H, C4, (1, V)) with BatchNorm1d(affine=False) folded in
    y = jnp.dot(x, w_pre, preferred_element_type=f32) + b_pre    # (32, 32)
    y = inception(y, wb1, wf1, t1)
    y = inception(y, wb2, wf2, t2)

    # final Conv1d(C4, 1, 1) + collapsed affine head:
    #   out[b] = sum_l head_w[l] * (y[b*L + l] @ w_fc) + const
    zcol = jnp.dot(y, w_fc, preferred_element_type=f32)          # (32, 1)
    out_ref[...] = jnp.sum(zcol * sel, axis=0, keepdims=True) + const   # (1, B)


# ----------------------------- parameter construction -----------------------------
def _bn_fold(gamma, beta, mean, var):
    scale = gamma / jnp.sqrt(var + EPS)
    return scale, beta - mean * scale


def init_params(key):
    ks = jax.random.split(key, 12)

    def rnd(k, shape, scale=0.1):
        return scale * jax.random.normal(k, shape, jnp.float32)

    p = {}
    # preconv Conv2d(H, C4, (1, V)): torch weight (C4, H, 1, V) -> matmul (H*V, C4)
    w_pre = rnd(ks[0], (C4, H, 1, V))
    p['w_pre'] = w_pre.reshape(C4, H * V).T
    p['b_pre'] = rnd(ks[1], (1, C4))

    def inception_params(k):
        kk = jax.random.split(k, 5)
        d = {
            'wb': rnd(kk[0], (C4, NF)),
            'w9': rnd(kk[1], (KSS[0], NF, NF)),    # (k, in, out)
            'w5': rnd(kk[2], (KSS[1], NF, NF)),
            'w3': rnd(kk[3], (KSS[2], NF, NF)),
            'wmp': rnd(kk[4], (C4, NF)),
        }
        s, t = _bn_fold(jnp.ones((C4,)), jnp.zeros((C4,)),
                        jnp.zeros((C4,)), jnp.ones((C4,)))
        d['s'] = s.reshape(1, C4).astype(jnp.float32)
        d['t'] = t.reshape(1, C4).astype(jnp.float32)
        return d

    p['ib1'] = inception_params(ks[2])
    p['ib2'] = inception_params(ks[3])

    p['w_fc'] = rnd(ks[4], (C4, 1))
    p['b_fc'] = rnd(ks[5], (1, 1))

    s1, t1 = _bn_fold(jnp.ones((L,)), jnp.zeros((L,)), jnp.zeros((L,)), jnp.ones((L,)))
    p['bn1_s'], p['bn1_t'] = s1.reshape(L, 1), t1.reshape(L, 1)
    p['w_h1'] = rnd(ks[6], (L, L))            # torch (out, in), Linear(bias=False)
    s2, t2 = _bn_fold(jnp.ones((L,)), jnp.zeros((L,)), jnp.zeros((L,)), jnp.ones((L,)))
    p['bn2_s'], p['bn2_t'] = s2.reshape(L, 1), t2.reshape(L, 1)
    p['w_h2'] = rnd(ks[7], (L, L))
    p['w_h3'] = rnd(ks[8], (1, L))
    p['b_h3'] = jnp.full((1, 1), 0.5, jnp.float32)   # head[-1].bias.data.fill_(0.5)
    return p


def pack_params(p):
    """Fold BNs / biases / head offline and pack everything into one (176,128) slab."""
    f32 = jnp.float32
    bn0_scale = 1.0 / math.sqrt(1.0 + EPS)

    # preconv + BatchNorm1d(C4, affine=False) fold
    w_pre_f = p['w_pre'] * bn0_scale                 # (8, 32)
    b_pre_f = p['b_pre'] * bn0_scale                 # (1, 32)

    # inception block: fuse k=(9,5,3) taps + maxpool 1x1 into one (104, 32) matrix
    def fold_block(q):
        wf = jnp.zeros((STACKW, C4), f32)
        for di in range(KMAX):
            d = di - PAD
            r0 = di * NF
            wf = wf.at[r0:r0 + NF, 0:NF].set(q['w9'][di])
            if abs(d) <= KSS[1] // 2:
                wf = wf.at[r0:r0 + NF, NF:2 * NF].set(q['w5'][d + KSS[1] // 2])
            if abs(d) <= KSS[2] // 2:
                wf = wf.at[r0:r0 + NF, 2 * NF:3 * NF].set(q['w3'][d + KSS[2] // 2])
        wf = wf.at[KMAX * NF:, 3 * NF:4 * NF].set(q['wmp'])
        wf = wf * q['s'][0][None, :]                 # fold BN scale into out columns
        return wf, q['wb'], q['t']

    wf1, wb1, t1 = fold_block(p['ib1'])
    wf2, wb2, t2 = fold_block(p['ib2'])

    # collapse the affine head: BN -> Linear -> BN -> Linear -> Linear(+0.5)
    s1 = p['bn1_s'][:, 0]; b1 = p['bn1_t'][:, 0]
    s2 = p['bn2_s'][:, 0]; b2 = p['bn2_t'][:, 0]
    W1, W2, W3 = p['w_h1'], p['w_h2'], p['w_h3']
    D1 = s1[:, None] * W1.T
    D2 = s2[:, None] * W2.T
    head_w = (D1 @ D2 @ W3.T)[:, 0]                  # (L,)
    head_b = (((b1[None, :] @ W1.T) @ D2 + b2[None, :] @ W2.T) @ W3.T
              + p['b_h3'])[0, 0]

    # per-batch row-selection weights + folded constant (Conv1d bias + head bias)
    sel = jnp.zeros((N, B), f32)
    for b in range(B):
        sel = sel.at[b * L:(b + 1) * L, b].set(head_w)
    const = jnp.full((1, B), p['b_fc'][0, 0] * jnp.sum(head_w) + head_b, f32)

    # im2col validity mask: zero any tap that falls outside its batch segment
    li = jnp.arange(N) % L
    blocks = []
    for di in range(KMAX):
        d = di - PAD
        valid = ((li + d >= 0) & (li + d < L)).astype(f32)
        blocks.append(jnp.tile(valid[:, None], (1, NF)))
    blocks.append(jnp.ones((N, C4), f32))            # maxpool columns: always valid
    mask = jnp.concatenate(blocks, axis=1)           # (32, 104)

    # one packed slab
    P = jnp.zeros((PROWS, PLANES), f32)
    P = P.at[0:8, 0:C4].set(w_pre_f)
    P = P.at[0:1, 32:64].set(b_pre_f)
    P = P.at[0:1, 64:96].set(t1)
    P = P.at[0:1, 96:128].set(t2)
    P = P.at[8:40, 0:NF].set(wb1)
    P = P.at[8:40, NF:2 * NF].set(wb2)
    P = P.at[8:40, 16:17].set(p['w_fc'])
    P = P.at[8:40, 24:24 + B].set(sel)
    P = P.at[8:9, 32:32 + B].set(const)
    P = P.at[40:144, 0:C4].set(wf1)
    P = P.at[40:144, C4:2 * C4].set(wf2)
    P = P.at[144:176, 0:STACKW].set(mask)
    return P


# ---------------------------------- kernel wrapper ----------------------------------
def hs_model_forward(x, packed):
    # x: (B, L, H, V) -- same axis order as the PyTorch module input 'b l h v'
    xf = x.astype(jnp.float32).reshape(N, H * V)     # batch stacked on sublanes
    out = pl.pallas_call(
        hs_kernel,
        out_shape=jax.ShapeDtypeStruct((1, B), jnp.float32),
        grid=(1,),
        in_specs=[pl.BlockSpec((N, H * V), lambda i: (0, 0)),
                  pl.BlockSpec((PROWS, PLANES), lambda i: (0, 0))],
        out_specs=pl.BlockSpec((1, B), lambda i: (0, 0)),
        compiler_params=pltpu.CompilerParams(dimension_semantics=("arbitrary",)),
    )(xf, packed)
    return out[0]                                    # (B,)


# ------------------------------ pure-JAX reference ------------------------------
def reference_forward(x, p):
    xf = x.astype(jnp.float32).reshape(B, L, H * V)

    def one(xb):
        y = xb @ p['w_pre'] + p['b_pre']
        y = y / jnp.sqrt(1.0 + EPS)

        def conv1d_same(z, wk):
            k = wk.shape[0]
            pad = k // 2
            zp = jnp.pad(z, ((pad, pad), (0, 0)))
            return sum(zp[j:j + L] @ wk[j] for j in range(k))

        def inception(z, q):
            bott = z @ q['wb']
            b1 = conv1d_same(bott, q['w9'])
            b2 = conv1d_same(bott, q['w5'])
            b3 = conv1d_same(bott, q['w3'])
            zp = jnp.pad(z, ((1, 1), (0, 0)), constant_values=-jnp.inf)
            mp = jnp.maximum(jnp.maximum(zp[0:L], zp[1:L + 1]), zp[2:L + 2])
            b4 = mp @ q['wmp']
            cat = jnp.concatenate([b1, b2, b3, b4], axis=-1)
            return jnp.maximum(cat * q['s'] + q['t'], 0.0)

        y = inception(y, p['ib1'])
        y = inception(y, p['ib2'])
        z = y @ p['w_fc'] + p['b_fc']
        z = z * p['bn1_s'] + p['bn1_t']
        z = p['w_h1'] @ z
        z = z * p['bn2_s'] + p['bn2_t']
        z = p['w_h2'] @ z
        return (p['w_h3'] @ z + p['b_h3'])[0, 0]

    return jax.vmap(one)(xf)


if __name__ == "__main__":
    key = jax.random.PRNGKey(0)
    kx, kp = jax.random.split(key)
    x = jax.random.normal(kx, (B, L, H, V), jnp.float32)
    params = init_params(kp)
    packed = pack_params(params)

    out = hs_model_forward(x, packed)
    out = jax.block_until_ready(out)

    ref = jax.block_until_ready(reference_forward(x, params))
    assert out.shape == (B,), out.shape
    assert bool(jnp.all(jnp.isfinite(out)))
    assert jnp.allclose(out, ref, rtol=2e-3, atol=2e-3), (out, ref)
    print("KERNEL_OK")
</pallas_src>

<mosaic_0001>
module attributes {stable_mosaic.version = 11 : i64} {
  func.func @hs_kernel(%arg0: i32, %arg1: memref<32x8xf32, #tpu.memory_space<vmem>>, %arg2: memref<176x128xf32, #tpu.memory_space<vmem>>, %arg3: memref<1x2xf32, #tpu.memory_space<vmem>>) attributes {dimension_semantics = [#tpu.dimension_semantics<arbitrary>], iteration_bounds = array<i64: 1>, scalar_prefetch = 0 : i64, scratch_operands = 0 : i64, tpu.core_type = #tpu.core_type<tc>, window_params = [{pipeline_mode = #tpu.pipeline_mode<synchronous>, transform_indices = @transform_0, window_bounds = array<i64: 32, 8>}, {pipeline_mode = #tpu.pipeline_mode<synchronous>, transform_indices = @transform_1, window_bounds = array<i64: 176, 128>}, {pipeline_mode = #tpu.pipeline_mode<synchronous>, transform_indices = @transform_2, window_bounds = array<i64: 1, 2>}]} {
    %c0 = arith.constant 0 : index
    %c0_0 = arith.constant 0 : index
    %0 = vector.load %arg2[%c0, %c0_0] : memref<176x128xf32, #tpu.memory_space<vmem>>, vector<8x32xf32>
    %c0_1 = arith.constant 0 : index
    %c32 = arith.constant 32 : index
    %1 = vector.load %arg2[%c0_1, %c32] : memref<176x128xf32, #tpu.memory_space<vmem>>, vector<1x32xf32>
    %c0_2 = arith.constant 0 : index
    %c64 = arith.constant 64 : index
    %2 = vector.load %arg2[%c0_2, %c64] : memref<176x128xf32, #tpu.memory_space<vmem>>, vector<1x32xf32>
    %c0_3 = arith.constant 0 : index
    %c96 = arith.constant 96 : index
    %3 = vector.load %arg2[%c0_3, %c96] : memref<176x128xf32, #tpu.memory_space<vmem>>, vector<1x32xf32>
    %c8 = arith.constant 8 : index
    %c0_4 = arith.constant 0 : index
    %4 = vector.load %arg2[%c8, %c0_4] : memref<176x128xf32, #tpu.memory_space<vmem>>, vector<32x8xf32>
    %c8_5 = arith.constant 8 : index
    %c8_6 = arith.constant 8 : index
    %5 = vector.load %arg2[%c8_5, %c8_6] : memref<176x128xf32, #tpu.memory_space<vmem>>, vector<32x8xf32>
    %c8_7 = arith.constant 8 : index
    %c16 = arith.constant 16 : index
    %6 = vector.load %arg2[%c8_7, %c16] : memref<176x128xf32, #tpu.memory_space<vmem>>, vector<32x1xf32>
    %c8_8 = arith.constant 8 : index
    %c24 = arith.constant 24 : index
    %7 = vector.load %arg2[%c8_8, %c24] : memref<176x128xf32, #tpu.memory_space<vmem>>, vector<32x2xf32>
    %c8_9 = arith.constant 8 : index
    %c32_10 = arith.constant 32 : index
    %8 = vector.load %arg2[%c8_9, %c32_10] : memref<176x128xf32, #tpu.memory_space<vmem>>, vector<1x2xf32>
    %c40 = arith.constant 40 : index
    %c0_11 = arith.constant 0 : index
    %9 = vector.load %arg2[%c40, %c0_11] : memref<176x128xf32, #tpu.memory_space<vmem>>, vector<104x32xf32>
    %c40_12 = arith.constant 40 : index
    %c32_13 = arith.constant 32 : index
    %10 = vector.load %arg2[%c40_12, %c32_13] : memref<176x128xf32, #tpu.memory_space<vmem>>, vector<104x32xf32>
    %c144 = arith.constant 144 : index
    %c0_14 = arith.constant 0 : index
    %11 = vector.load %arg2[%c144, %c0_14] : memref<176x128xf32, #tpu.memory_space<vmem>>, vector<32x104xf32>
    %12 = vector.extract_strided_slice %11 {offsets = [0, 24], sizes = [32, 1], strides = [1, 1]} : vector<32x104xf32> to vector<32x1xf32>
    %13 = vector.extract_strided_slice %11 {offsets = [0, 40], sizes = [32, 1], strides = [1, 1]} : vector<32x104xf32> to vector<32x1xf32>
    %cst = arith.constant 0.000000e+00 : f32
    %14 = vector.broadcast %cst : f32 to vector<4x8xf32>
    %cst_15 = arith.constant 0.000000e+00 : f32
    %15 = vector.broadcast %cst_15 : f32 to vector<1x32xf32>
    %c0_16 = arith.constant 0 : index
    %c0_17 = arith.constant 0 : index
    %16 = vector.load %arg1[%c0_16, %c0_17] : memref<32x8xf32, #tpu.memory_space<vmem>>, vector<32x8xf32>
    %cst_18 = arith.constant dense<0.000000e+00> : vector<32x32xf32>
    %17 = tpu.matmul %16, %0, %cst_18 {dimension_numbers = #tpu.dot_dimension_numbers<[1], [0], [0], [1], [0, 0, 1, 1], [], []>} : vector<32x8xf32>, vector<8x32xf32>, vector<32x32xf32> -> vector<32x32xf32>
    %18 = vector.broadcast %1 : vector<1x32xf32> to vector<32x32xf32>
    %19 = arith.addf %17, %18 : vector<32x32xf32>
    %cst_19 = arith.constant dense<0.000000e+00> : vector<32x8xf32>
    %20 = tpu.matmul %19, %4, %cst_19 {dimension_numbers = #tpu.dot_dimension_numbers<[1], [0], [0], [1], [0, 0, 1, 1], [], []>} : vector<32x32xf32>, vector<32x8xf32>, vector<32x8xf32> -> vector<32x8xf32>
    %21 = vector.extract_strided_slice %20 {offsets = [0, 0], sizes = [28, 8], strides = [1, 1]} : vector<32x8xf32> to vector<28x8xf32>
    %22 = tpu.concatenate %14, %21 in 0 : vector<4x8xf32>, vector<28x8xf32> -> vector<32x8xf32>
    %23 = vector.extract_strided_slice %14 {offsets = [0, 0], sizes = [3, 8], strides = [1, 1]} : vector<4x8xf32> to vector<3x8xf32>
    %24 = vector.extract_strided_slice %20 {offsets = [0, 0], sizes = [29, 8], strides = [1, 1]} : vector<32x8xf32> to vector<29x8xf32>
    %25 = tpu.concatenate %23, %24 in 0 : vector<3x8xf32>, vector<29x8xf32> -> vector<32x8xf32>
    %26 = vector.extract_strided_slice %14 {offsets = [0, 0], sizes = [2, 8], strides = [1, 1]} : vector<4x8xf32> to vector<2x8xf32>
    %27 = vector.extract_strided_slice %20 {offsets = [0, 0], sizes = [30, 8], strides = [1, 1]} : vector<32x8xf32> to vector<30x8xf32>
    %28 = tpu.concatenate %26, %27 in 0 : vector<2x8xf32>, vector<30x8xf32> -> vector<32x8xf32>
    %29 = vector.extract_strided_slice %14 {offsets = [0, 0], sizes = [1, 8], strides = [1, 1]} : vector<4x8xf32> to vector<1x8xf32>
    %30 = vector.extract_strided_slice %20 {offsets = [0, 0], sizes = [31, 8], strides = [1, 1]} : vector<32x8xf32> to vector<31x8xf32>
    %31 = tpu.concatenate %29, %30 in 0 : vector<1x8xf32>, vector<31x8xf32> -> vector<32x8xf32>
    %32 = vector.extract_strided_slice %20 {offsets = [1, 0], sizes = [31, 8], strides = [1, 1]} : vector<32x8xf32> to vector<31x8xf32>
    %33 = vector.extract_strided_slice %14 {offsets = [0, 0], sizes = [1, 8], strides = [1, 1]} : vector<4x8xf32> to vector<1x8xf32>
    %34 = tpu.concatenate %32, %33 in 0 : vector<31x8xf32>, vector<1x8xf32> -> vector<32x8xf32>
    %35 = vector.extract_strided_slice %20 {offsets = [2, 0], sizes = [30, 8], strides = [1, 1]} : vector<32x8xf32> to vector<30x8xf32>
    %36 = vector.extract_strided_slice %14 {offsets = [0, 0], sizes = [2, 8], strides = [1, 1]} : vector<4x8xf32> to vector<2x8xf32>
    %37 = tpu.concatenate %35, %36 in 0 : vector<30x8xf32>, vector<2x8xf32> -> vector<32x8xf32>
    %38 = vector.extract_strided_slice %20 {offsets = [3, 0], sizes = [29, 8], strides = [1, 1]} : vector<32x8xf32> to vector<29x8xf32>
    %39 = vector.extract_strided_slice %14 {offsets = [0, 0], sizes = [3, 8], strides = [1, 1]} : vector<4x8xf32> to vector<3x8xf32>
    %40 = tpu.concatenate %38, %39 in 0 : vector<29x8xf32>, vector<3x8xf32> -> vector<32x8xf32>
    %41 = vector.extract_strided_slice %20 {offsets = [4, 0], sizes = [28, 8], strides = [1, 1]} : vector<32x8xf32> to vector<28x8xf32>
    %42 = tpu.concatenate %41, %14 in 0 : vector<28x8xf32>, vector<4x8xf32> -> vector<32x8xf32>
    %43 = vector.extract_strided_slice %19 {offsets = [0, 0], sizes = [31, 32], strides = [1, 1]} : vector<32x32xf32> to vector<31x32xf32>
    %44 = tpu.concatenate %15, %43 in 0 : vector<1x32xf32>, vector<31x32xf32> -> vector<32x32xf32>
    %45 = vector.extract_strided_slice %19 {offsets = [1, 0], sizes = [31, 32], strides = [1, 1]} : vector<32x32xf32> to vector<31x32xf32>
    %46 = tpu.concatenate %45, %15 in 0 : vector<31x32xf32>, vector<1x32xf32> -> vector<32x32xf32>
    %cst_20 = arith.constant 0.000000e+00 : f32
    %47 = vector.broadcast %cst_20 : f32 to vector<32x1xf32>
    %48 = arith.cmpf ogt, %12, %47 : vector<32x1xf32>
    %49 = vector.shape_cast %48 : vector<32x1xi1> to vector<32x1xi1>
    %50 = vector.broadcast %49 : vector<32x1xi1> to vector<32x32xi1>
    %51 = arith.select %50, %44, %19 : vector<32x32xi1>, vector<32x32xf32>
    %52 = arith.maximumf %19, %51 : vector<32x32xf32>
    %cst_21 = arith.constant 0.000000e+00 : f32
    %53 = vector.broadcast %cst_21 : f32 to vector<32x1xf32>
    %54 = arith.cmpf ogt, %13, %53 : vector<32x1xf32>
    %55 = vector.shape_cast %54 : vector<32x1xi1> to vector<32x1xi1>
    %56 = vector.broadcast %55 : vector<32x1xi1> to vector<32x32xi1>
    %57 = arith.select %56, %46, %19 : vector<32x32xi1>, vector<32x32xf32>
    %58 = arith.maximumf %52, %57 : vector<32x32xf32>
    %59 = tpu.concatenate %22, %25, %28, %31, %20, %34, %37, %40, %42, %58 in 1 : vector<32x8xf32>, vector<32x8xf32>, vector<32x8xf32>, vector<32x8xf32>, vector<32x8xf32>, vector<32x8xf32>, vector<32x8xf32>, vector<32x8xf32>, vector<32x8xf32>, vector<32x32xf32> -> vector<32x104xf32>
    %60 = arith.mulf %59, %11 : vector<32x104xf32>
    %cst_22 = arith.constant dense<0.000000e+00> : vector<32x32xf32>
    %61 = tpu.matmul %60, %9, %cst_22 {dimension_numbers = #tpu.dot_dimension_numbers<[1], [0], [0], [1], [0, 0, 1, 1], [], []>} : vector<32x104xf32>, vector<104x32xf32>, vector<32x32xf32> -> vector<32x32xf32>
    %62 = vector.broadcast %2 : vector<1x32xf32> to vector<32x32xf32>
    %63 = arith.addf %61, %62 : vector<32x32xf32>
    %cst_23 = arith.constant 0.000000e+00 : f32
    %64 = vector.broadcast %cst_23 : f32 to vector<32x32xf32>
    %65 = arith.maximumf %63, %64 : vector<32x32xf32>
    %cst_24 = arith.constant dense<0.000000e+00> : vector<32x8xf32>
    %66 = tpu.matmul %65, %5, %cst_24 {dimension_numbers = #tpu.dot_dimension_numbers<[1], [0], [0], [1], [0, 0, 1, 1], [], []>} : vector<32x32xf32>, vector<32x8xf32>, vector<32x8xf32> -> vector<32x8xf32>
    %67 = vector.extract_strided_slice %66 {offsets = [0, 0], sizes = [28, 8], strides = [1, 1]} : vector<32x8xf32> to vector<28x8xf32>
    %68 = tpu.concatenate %14, %67 in 0 : vector<4x8xf32>, vector<28x8xf32> -> vector<32x8xf32>
    %69 = vector.extract_strided_slice %14 {offsets = [0, 0], sizes = [3, 8], strides = [1, 1]} : vector<4x8xf32> to vector<3x8xf32>
    %70 = vector.extract_strided_slice %66 {offsets = [0, 0], sizes = [29, 8], strides = [1, 1]} : vector<32x8xf32> to vector<29x8xf32>
    %71 = tpu.concatenate %69, %70 in 0 : vector<3x8xf32>, vector<29x8xf32> -> vector<32x8xf32>
    %72 = vector.extract_strided_slice %14 {offsets = [0, 0], sizes = [2, 8], strides = [1, 1]} : vector<4x8xf32> to vector<2x8xf32>
    %73 = vector.extract_strided_slice %66 {offsets = [0, 0], sizes = [30, 8], strides = [1, 1]} : vector<32x8xf32> to vector<30x8xf32>
    %74 = tpu.concatenate %72, %73 in 0 : vector<2x8xf32>, vector<30x8xf32> -> vector<32x8xf32>
    %75 = vector.extract_strided_slice %14 {offsets = [0, 0], sizes = [1, 8], strides = [1, 1]} : vector<4x8xf32> to vector<1x8xf32>
    %76 = vector.extract_strided_slice %66 {offsets = [0, 0], sizes = [31, 8], strides = [1, 1]} : vector<32x8xf32> to vector<31x8xf32>
    %77 = tpu.concatenate %75, %76 in 0 : vector<1x8xf32>, vector<31x8xf32> -> vector<32x8xf32>
    %78 = vector.extract_strided_slice %66 {offsets = [1, 0], sizes = [31, 8], strides = [1, 1]} : vector<32x8xf32> to vector<31x8xf32>
    %79 = vector.extract_strided_slice %14 {offsets = [0, 0], sizes = [1, 8], strides = [1, 1]} : vector<4x8xf32> to vector<1x8xf32>
    %80 = tpu.concatenate %78, %79 in 0 : vector<31x8xf32>, vector<1x8xf32> -> vector<32x8xf32>
    %81 = vector.extract_strided_slice %66 {offsets = [2, 0], sizes = [30, 8], strides = [1, 1]} : vector<32x8xf32> to vector<30x8xf32>
    %82 = vector.extract_strided_slice %14 {offsets = [0, 0], sizes = [2, 8], strides = [1, 1]} : vector<4x8xf32> to vector<2x8xf32>
    %83 = tpu.concatenate %81, %82 in 0 : vector<30x8xf32>, vector<2x8xf32> -> vector<32x8xf32>
    %84 = vector.extract_strided_slice %66 {offsets = [3, 0], sizes = [29, 8], strides = [1, 1]} : vector<32x8xf32> to vector<29x8xf32>
    %85 = vector.extract_strided_slice %14 {offsets = [0, 0], sizes = [3, 8], strides = [1, 1]} : vector<4x8xf32> to vector<3x8xf32>
    %86 = tpu.concatenate %84, %85 in 0 : vector<29x8xf32>, vector<3x8xf32> -> vector<32x8xf32>
    %87 = vector.extract_strided_slice %66 {offsets = [4, 0], sizes = [28, 8], strides = [1, 1]} : vector<32x8xf32> to vector<28x8xf32>
    %88 = tpu.concatenate %87, %14 in 0 : vector<28x8xf32>, vector<4x8xf32> -> vector<32x8xf32>
    %89 = vector.extract_strided_slice %65 {offsets = [0, 0], sizes = [31, 32], strides = [1, 1]} : vector<32x32xf32> to vector<31x32xf32>
    %90 = tpu.concatenate %15, %89 in 0 : vector<1x32xf32>, vector<31x32xf32> -> vector<32x32xf32>
    %91 = vector.extract_strided_slice %65 {offsets = [1, 0], sizes = [31, 32], strides = [1, 1]} : vector<32x32xf32> to vector<31x32xf32>
    %92 = tpu.concatenate %91, %15 in 0 : vector<31x32xf32>, vector<1x32xf32> -> vector<32x32xf32>
    %cst_25 = arith.constant 0.000000e+00 : f32
    %93 = vector.broadcast %cst_25 : f32 to vector<32x1xf32>
    %94 = arith.cmpf ogt, %12, %93 : vector<32x1xf32>
    %95 = vector.shape_cast %94 : vector<32x1xi1> to vector<32x1xi1>
    %96 = vector.broadcast %95 : vector<32x1xi1> to vector<32x32xi1>
    %97 = arith.select %96, %90, %65 : vector<32x32xi1>, vector<32x32xf32>
    %98 = arith.maximumf %65, %97 : vector<32x32xf32>
    %cst_26 = arith.constant 0.000000e+00 : f32
    %99 = vector.broadcast %cst_26 : f32 to vector<32x1xf32>
    %100 = arith.cmpf ogt, %13, %99 : vector<32x1xf32>
    %101 = vector.shape_cast %100 : vector<32x1xi1> to vector<32x1xi1>
    %102 = vector.broadcast %101 : vector<32x1xi1> to vector<32x32xi1>
    %103 = arith.select %102, %92, %65 : vector<32x32xi1>, vector<32x32xf32>
    %104 = arith.maximumf %98, %103 : vector<32x32xf32>
    %105 = tpu.concatenate %68, %71, %74, %77, %66, %80, %83, %86, %88, %104 in 1 : vector<32x8xf32>, vector<32x8xf32>, vector<32x8xf32>, vector<32x8xf32>, vector<32x8xf32>, vector<32x8xf32>, vector<32x8xf32>, vector<32x8xf32>, vector<32x8xf32>, vector<32x32xf32> -> vector<32x104xf32>
    %106 = arith.mulf %105, %11 : vector<32x104xf32>
    %cst_27 = arith.constant dense<0.000000e+00> : vector<32x32xf32>
    %107 = tpu.matmul %106, %10, %cst_27 {dimension_numbers = #tpu.dot_dimension_numbers<[1], [0], [0], [1], [0, 0, 1, 1], [], []>} : vector<32x104xf32>, vector<104x32xf32>, vector<32x32xf32> -> vector<32x32xf32>
    %108 = vector.broadcast %3 : vector<1x32xf32> to vector<32x32xf32>
    %109 = arith.addf %107, %108 : vector<32x32xf32>
    %cst_28 = arith.constant 0.000000e+00 : f32
    %110 = vector.broadcast %cst_28 : f32 to vector<32x32xf32>
    %111 = arith.maximumf %109, %110 : vector<32x32xf32>
    %cst_29 = arith.constant dense<0.000000e+00> : vector<32x1xf32>
    %112 = tpu.matmul %111, %6, %cst_29 {dimension_numbers = #tpu.dot_dimension_numbers<[1], [0], [0], [1], [0, 0, 1, 1], [], []>} : vector<32x32xf32>, vector<32x1xf32>, vector<32x1xf32> -> vector<32x1xf32>
    %113 = vector.broadcast %112 : vector<32x1xf32> to vector<32x2xf32>
    %114 = arith.mulf %113, %7 : vector<32x2xf32>
    %cst_30 = arith.constant dense<0.000000e+00> : vector<2xf32>
    %115 = vector.multi_reduction <add>, %114, %cst_30 [0] : vector<32x2xf32> to vector<2xf32>
    %116 = vector.shape_cast %115 : vector<2xf32> to vector<1x2xf32>
    %117 = arith.addf %116, %8 : vector<1x2xf32>
    %c0_31 = arith.constant 0 : index
    %c0_32 = arith.constant 0 : index
    %118 = vector.load %arg3[%c0_31, %c0_32] : memref<1x2xf32, #tpu.memory_space<vmem>>, vector<1x2xf32>
    tpu.vector_store %arg3[%c0_31, %c0_32], %117 {strides = array<i32>} : memref<1x2xf32, #tpu.memory_space<vmem>>, vector<1x2xf32>,
    return
  }
  func.func @transform_0(%arg0: i32) -> (i32, i32) {
    %c0_i32 = arith.constant 0 : i32
    %c0_i32_0 = arith.constant 0 : i32
    %c0_i32_1 = arith.constant 0 : i32
    return %c0_i32, %c0_i32_0 : i32, i32
  }
  func.func @transform_1(%arg0: i32) -> (i32, i32) {
    %c0_i32 = arith.constant 0 : i32
    %c0_i32_0 = arith.constant 0 : i32
    %c0_i32_1 = arith.constant 0 : i32
    return %c0_i32, %c0_i32_0 : i32, i32
  }
  func.func @transform_2(%arg0: i32) -> (i32, i32) {
    %c0_i32 = arith.constant 0 : i32
    %c0_i32_0 = arith.constant 0 : i32
    %c0_i32_1 = arith.constant 0 : i32
    return %c0_i32, %c0_i32_0 : i32, i32
  }
}

</mosaic_0001>

<bundles_post_ra>
// kernel: tpu_custom_call.1
= control target key start
LH: loop header
LB: loop body
LE: loop exit
PB: predicated region body
PF: predicated region fallthrough
CT: control target
= control target key end

     0   :  { %7 = vsyncpa [#allocation3], 0  ;;  %s2441_s0 = inlined_call_operand.vmem [shape: f32[32,8], index: 0, kind: input, shape index: {}]   ;;  %s2442_s1 = inlined_call_operand.hbm [shape: f32[176,128], index: 1, kind: input, shape index: {}]   ;;  %s2443_s2 = inlined_call_operand.hbm [shape: f32[1,2], index: 2, kind: output, shape index: {}]  }
   0x1   :  { %8 = vsyncpa [#allocation4], 0  ;;  %s1809_s9 = smov [#allocation2]   ;;  %s1761_s13 = scalar_lea.hbm %s2442_s1, 2816 }
   0x2   :  { %s16_s10 = sshll.u32 %s1809_s9, 4  ;;  %p1762_p0 = scmp.ne.s32.totalorder %s2442_s1, %s1761_s13  ;;  %s17_s10 = int_to_ptr.vmem [resolvable:$true] %s16_s10 }
   0x3   :  { %p1765_p1 = scmp.lt.u32.totalorder %s1761_s13, %s2442_s1 }
   0x5   :  { %p1767_p2 = pnand %p1765_p1, %p1762_p0 }
   0x7   :  { %1770 = shalt.err (!%p1767_p2)
}
   0x8   :  { %s1771_s18 = scalar_lea.vmem %s17_s10, 2816  ;;  %p1776_p4 = scmp.lt.s32.totalorder %s17_s10, %s17_s10 }
   0x9   :  { %p1772_p3 = scmp.ne.s32.totalorder %s17_s10, %s1771_s18  ;;  %p1777_p5 = scmp.lt.s32.totalorder %s1771_s18, %s1771_s18 }
   0xb   :  { %p1778_p6 = por %p1777_p5, %p1776_p4 }
   0xd   :  { %p1779_p7 = pnand %p1778_p6, %p1772_p3 }
   0xf   :  { %1782 = shalt.err (!%p1779_p7)
}
  0x10   :  { %s1810_s19 = smov 128   ;;  %s1811_s20 = smov 8  }
  0x11   :  { %22 = dma.hbm_to_vmem [thread:$0]  %s2442_s1, 2816, %s17_s10, [#allocation3], %s1810_s19, %s1810_s19, %s1811_s20  }
  0x12   :  { %1805 = dma.done.wait [#allocation3], 2816  }
  0x13   :  { %1806 = vsyncadd [#allocation3], 4294964480  ;;  %v1812_v0 = vmov 24   ;;  %vm62_vm0 = vcmask 64512   ;;  %v26_v1 = vld [vmem:[#allocation2] sm:$0xff]  ;;  %v51_v3 = vld [vmem:[%s2441_s0 + $0x8] sm:$0xff] }
  0x14   :  { %1695 = vset.pattern.permute.xlu1 %v1812_v0  ;;  %1694 = vset.pattern.permute.xlu0 %v1812_v0  ;;  %v50_v2 = vld [vmem:[%s2441_s0] sm:$0xff]  ;;  %v52_v4 = vld [vmem:[%s2441_s0 + $0x10] sm:$0xff]  ;;  %v1866_v5 = vld [vmem:[#allocation2 + $0x98] sm:$0xff]  ;;  %v1813_v8 = vmov 0   ;;  %s1814_s28 = smov 96   ;;  %v1815_v13 = vmov 40  }
  0x15   :  { %1489 = vmatprep.subr.mxu0 %v26_v1  ;;  %1491 = vmatprep.mubr.msk.f32.mxu0 %vm62_vm0, %v50_v2  ;;  %vm362_vm1 = vcmp.gt.f32.partialorder %v1866_v5, 0.0  ;;  %v1869_v6 = vld [vmem:[#allocation2 + $0x90] sm:$0xff]  ;;  %v1871_v7 = vld [vmem:[#allocation2] ss:$0 sm:$0xff]  ;;  %v53_v11 = vld [vmem:[%s2441_s0 + $0x18] sm:$0xff]  ;;  %vm160_vm5 = vcmask 261120  }
  0x16   :  { %1490 = vmatpush3.msra.mxu0 %v26_v1  ;;  %v366_v9 = vsel %vm362_vm1, 1, %v1813_v8  ;;  %vm361_vm2 = vcmp.gt.f32.partialorder %v1869_v6, 0.0  ;;  %59 = vrot.lane.b32.xlu0 %v1871_v7, %s1814_s28  ;;  %v1877_v10 = vld [vmem:[#allocation2 + $0xa0] sm:$0xff]  ;;  %v1885_v15 = vld [vmem:[#allocation2 + $0xa8] sm:$0xff]  ;;  %v1889_v17 = vld [vmem:[#allocation2 + $0x10] sm:$0xff]  ;;  %vm295_vm6 = vcmask 1040384  }
  0x17   :  { %1492 = vmatmul.mubr.msk.f32.vlgmr.msra.gmra.mrb[0].mxu0 %vm62_vm0, %v51_v3  ;;  %373 = vperm.xlu1 %1695, %v366_v9   ;;  %vm363_vm3 = vcmp.gt.f32.partialorder %v1877_v10, 0.0  ;;  %v365_v12 = vsel %vm361_vm2, 1, %v1813_v8  ;;  %v1887_v16 = vld [vmem:[#allocation2 + $0x8] sm:$0xff]  ;;  %vm364_vm4 = vcmp.gt.f32.partialorder %v1885_v15, 0.0  ;;  %v1894_v20 = vld [vmem:[#allocation2 + $0x18] sm:$0xff]  ;;  %v1896_v21 = vld [vmem:[#allocation2 + $0x20] sm:$0xff] }
  0x18   :  { %1494 = vmatprep.mubr.msk.f32.mxu0 %vm62_vm0, %v52_v4  ;;  %v367_v14 = vsel %vm363_vm3, 1, %v1813_v8  ;;  %v1603_v18 = vpack.c.bf16 %v1889_v17, %v1887_v16  ;;  %v368_v19 = vsel %vm364_vm4, 1, %v1813_v8  ;;  %v1607_v22 = vpack.c.bf16 %v1896_v21, %v1894_v20  ;;  %s1816_s0 = smov 72   ;;  %s1817_s3 = smov 32  }
  0x19   :  { %vm305_vm8 = vcmask 1046528   ;;  %vm2448_vm1 = vcmask 1042432   ;;  %vm2447_vm2 = vcmask 1041408   ;;  %vm2446_vm3 = vcmask 1045504   ;;  %s1818_s4 = smov 16   ;;  %s1819_s5 = smov 24  }
  0x1a   :  { %370 = vperm.xlu0 %1694, %v365_v12   ;;  %1604 = vmatprep.subr.bf16.mxu1 %v1603_v18  ;;  %vm2445_vm4 = vcmask 1044480   ;;  %s1820_s6 = smov 40   ;;  %s1821_s7 = smov 48  }
  0x1b   :  { %1495 = vmatmul.mubr.msk.f32.gmra.mrb[2].mxu0 %vm62_vm0, %v53_v11  ;;  %1696 = vset.pattern.permute.xlu1 %v1815_v13  ;;  %s1822_s8 = smov 56   ;;  %s1823_s9 = smov 64  }
  0x1c   :  { %394 = vperm.xlu1 %1696, %v365_v12   ;;  %1606 = vmatpush3.bf16.msra.mxu1 %v1603_v18  ;;  %s1824_s10 = smov 120   ;;  %s1825_s11 = smov 112  }
  0x1d   :  { %1608 = vmatprep.subr.bf16.mxu1 %v1607_v22  ;;  %s1826_s12 = smov 104   ;;  %s1827_s13 = smov [#allocation5]  }
  0x1e   :  { %376 = vperm.xlu0 %1694, %v367_v14   ;;  %s1392_s14 = sshll.u32 %s1827_s13, 4  ;;  %s1393_s14 = int_to_ptr.vmem [resolvable:$true] %s1392_s14 }
  0x1f   :  { %s1783_s15 = scalar_lea.vmem %s1393_s14, 16  ;;  %s1787_s16 = scalar_lea.vmem %s1393_s14, 32 }
  0x20   :  { %397 = vperm.xlu1 %1696, %v366_v9   ;;  %1610 = vmatpush3.bf16.msra.mxu1 %v1607_v22  ;;  %p1784_p8 = scmp.ne.s32.totalorder %s1393_s14, %s1783_s15  ;;  %p1788_p9 = scmp.lt.s32.totalorder %s1393_s14, %s1393_s14 }
  0x21   :  { %p1789_p10 = scmp.lt.s32.totalorder %s1787_s16, %s1783_s15 }
  0x22   :  { %1698 = vset.pattern.permute.xlu0 %v1815_v13 }
  0x23   :  { %400 = vperm.xlu0 %1698, %v367_v14   ;;  %p1790_p11 = por %p1789_p10, %p1788_p9 }
  0x24   :  { %1697 = vset.pattern.permute.xlu1 %v1812_v0 }
  0x25   :  { %379 = vperm.xlu1 %1697, %v368_v19   ;;  %p1791_p12 = pnand %p1790_p11, %p1784_p8 }
  0x27   :  { %1751 = vset.pattern.permute.xlu0 %v1813_v8 }
  0x29   :  { %1699 = vset.pattern.permute.xlu1 %v1815_v13 }
  0x2a   :  { %403 = vperm.xlu1 %1699, %v368_v19  }
  0x2e   :  { %1750 = vset.pattern.permute.xlu1 %v1813_v8 }
  0x88   :  { %v60_v24 = vpop.permute.xlu0 %59 }
  0x96   :  { %v1900_v23 = vpop.permute.xlu1 %373 }
  0x97   :  { %vm382_vm7 = vcmp.eq.s32.totalorder %v1900_v23, 1 }
  0x99   :  { %v1904_v26 = vpop.permute.xlu0 %370 }
  0x9a   :  { %vm381_vm10 = vcmp.eq.s32.totalorder %v1904_v26, 1 }
  0x9b   :  { %v1902_v25 = vpop.permute.xlu1 %394 }
  0x9c   :  { %vm405_vm9 = vcmp.eq.s32.totalorder %v1902_v25, 1 }
  0x9d   :  { %v1908_v28 = vpop.permute.xlu0 %376 }
  0x9e   :  { %vm2452_vm12 = vcmp.eq.s32.totalorder %v1908_v28, 1 }
  0x9f   :  { %v1906_v27 = vpop.permute.xlu1 %397 }
  0xa0   :  { %vm406_vm14 = vcmp.eq.s32.totalorder %v1906_v27, 1 }
  0xa2   :  { %v1912_v34 = vpop.permute.xlu0 %400 }
  0xa3   :  { %vm2451_vm13 = vcmp.eq.s32.totalorder %v1912_v34, 1 }
  0xa4   :  { %v1910_v30 = vpop.permute.xlu1 %379 }
  0xa5   :  { %vm2450_vm11 = vcmp.eq.s32.totalorder %v1910_v30, 1 }
  0xa9   :  { %v1922_v43 = vpop.permute.xlu1 %403 }
  0xaa   :  { %vm2444_vm15 = vcmp.eq.s32.totalorder %v1922_v43, 1 }
  0xea   :  { %v1493_v29 = vpop.f32.mrb[0].mxu0 }
  0xeb   :  { %v147_v31 = vadd.f32 %v1493_v29, %v60_v24  ;;  %v141_v32 = vpop.f32.mrb[1].mxu0 }
  0xec   :  { %v142_v33 = vadd.f32 %v141_v32, %v60_v24 }
  0xed   :  { %v338_v35 = vrot.slane %v147_v31, 7  ;;  %v350_v36 = vrot.slane %v147_v31, 1 }
  0xee   :  { %v1496_v37 = vpop.f32.mrb[2].mxu0  ;;  %1505 = vmatprep.mubr.msk.f32.mxu1 %vm160_vm5, %v142_v33  ;;  %v337_v38 = vrot.slane %v142_v33, 7  ;;  %v349_v39 = vrot.slane %v142_v33, 1 }
  0xef   :  { %v157_v40 = vadd.f32 %v1496_v37, %v60_v24  ;;  %v151_v41 = vpop.f32.mrb[3].mxu0  ;;  %1506 = vmatmul.mubr.msk.f32.vlgmr.msra.gmra.mrb[0].mxu1 %vm160_vm5, %v147_v31 }
  0xf0   :  { %v152_v42 = vadd.f32 %v151_v41, %v60_v24  ;;  %v348_v44 = vsel %vm295_vm6, 0.0, %v337_v38  ;;  %v351_v45 = vsel %vm305_vm8, %v349_v39, %v350_v36  ;;  %v339_v46 = vsel %vm295_vm6, %v337_v38, %v338_v35 }
  0xf1   :  { %v342_v47 = vrot.slane %v157_v40, 7  ;;  %v354_v48 = vrot.slane %v157_v40, 1  ;;  %v385_v49 = vsel %vm381_vm10, %v348_v44, %v142_v33  ;;  %v409_v50 = vsel %vm405_vm9, %v351_v45, %v142_v33 }
  0xf2   :  { %v340_v51 = vrot.slane %v152_v42, 7  ;;  %1508 = vmatprep.mubr.msk.f32.mxu1 %vm160_vm5, %v152_v42  ;;  %v352_v52 = vrot.slane %v152_v42, 1  ;;  %v389_v53 = vmax.f32 %v142_v33, %v385_v49  ;;  %v386_v54 = vsel %vm382_vm7, %v339_v46, %v147_v31 }
  0xf3   :  { %1509 = vmatmul.mubr.msk.f32.gmra.mrb[2].mxu1 %vm160_vm5, %v157_v40  ;;  %v390_v55 = vmax.f32 %v147_v31, %v386_v54  ;;  %v360_v57 = vsel %vm305_vm8, %v354_v48, 0.0 }
  0xf4   :  { %v343_v56 = vsel %vm295_vm6, %v340_v51, %v342_v47  ;;  %v341_v58 = vsel %vm295_vm6, %v338_v35, %v340_v51  ;;  %v355_v59 = vsel %vm305_vm8, %v352_v52, %v354_v48  ;;  %v413_v63 = vmax.f32 %v389_v53, %v409_v50 }
  0xf5   :  { %v388_v60 = vsel %vm2450_vm11, %v343_v56, %v157_v40  ;;  %v387_v61 = vsel %vm2452_vm12, %v341_v58, %v152_v42  ;;  %v411_v62 = vsel %vm2451_vm13, %v355_v59, %v152_v42  ;;  %v353_v2 = vsel %vm305_vm8, %v350_v36, %v352_v52 }
  0xf6   :  { %v392_v0 = vmax.f32 %v157_v40, %v388_v60  ;;  %v391_v1 = vmax.f32 %v152_v42, %v387_v61  ;;  %v412_v3 = vsel %vm2444_vm15, %v360_v57, %v157_v40  ;;  %524 = vrot.lane.b32.xlu0 %v413_v63, %s1816_s0  ;;  %v410_v4 = vsel %vm406_vm14, %v353_v2, %v147_v31 }
  0xf7   :  { %v414_v11 = vmax.f32 %v390_v55, %v410_v4  ;;  %vm2449_vm15 = vcmask 1043456   ;;  %vm2455_vm11 = vcmask 523264   ;;  %vm2454_vm13 = vcmask 588800  }
  0xf8   :  { %v1953_v8 = vmax.f32 %v392_v0, %v412_v3  ;;  %v1955_v9 = vmax.f32 %v391_v1, %v411_v62  ;;  %vm2453_vm12 = vcmask 850944  }
  0xf9   :  { %526 = vrot.lane.b32.xlu1 %v414_v11, %s1816_s0 }
 0x1c2   :  { %v1958_v12 = vpop.f32.mrb[0].mxu1 }
 0x1c3   :  { %458 = vrot.lane.b32.xlu1 %v1958_v12, %s1817_s3  ;;  %v1962_v13 = vpop.f32.mrb[1].mxu1  ;;  %v277_v14 = vrot.slane %v1958_v12, 5  ;;  %v287_v18 = vrot.slane %v1958_v12, 6  ;;  %v297_v19 = vrot.slane %v1958_v12, 7  ;;  %v307_v22 = vrot.slane %v1958_v12, 1 }
 0x1c4   :  { %v276_v24 = vrot.slane %v1962_v13, 5  ;;  %v286_v29 = vrot.slane %v1962_v13, 6  ;;  %v296_v31 = vrot.slane %v1962_v13, 7  ;;  %v306_v32 = vrot.slane %v1962_v13, 1 }
 0x1c5   :  { %v316_v33 = vrot.slane %v1962_v13, 2  ;;  %v317_v35 = vrot.slane %v1958_v12, 2  ;;  %v326_v36 = vrot.slane %v1962_v13, 3  ;;  %v327_v37 = vrot.slane %v1958_v12, 3 }
 0x1c6   :  { %v1976_v38 = vpop.f32.mrb[2].mxu1  ;;  %v278_v39 = vsel %vm2448_vm1, %v276_v24, %v277_v14  ;;  %v288_v40 = vsel %vm2447_vm2, %v286_v29, %v287_v18  ;;  %v298_v42 = vsel %vm295_vm6, %v296_v31, %v297_v19  ;;  %v308_v44 = vsel %vm305_vm8, %v306_v32, %v307_v22 }
 0x1c7   :  { %456 = vrot.lane.b32.xlu1 %v1962_v13, %s1817_s3  ;;  %420 = vrot.lane.b32.xlu0 %v278_v39, %s1811_s20  ;;  %v1983_v41 = vpop.f32.mrb[3].mxu1  ;;  %v318_v45 = vsel %vm2446_vm3, %v316_v33, %v317_v35  ;;  %v328_v46 = vsel %vm2445_vm4, %v326_v36, %v327_v37  ;;  %v263_v47 = vrot.slane %v1962_v13, 4  ;;  %v264_v48 = vrot.slane %v1958_v12, 4  ;;  %v2063_v39 = vld [vmem:[#allocation2 + $0x30] sm:$0xff] }
 0x1c8   :  { %v279_v49 = vrot.slane %v1983_v41, 5  ;;  %v281_v50 = vrot.slane %v1976_v38, 5  ;;  %v309_v51 = vrot.slane %v1983_v41, 1  ;;  %v284_v52 = vsel %vm2448_vm1, 0.0, %v276_v24 }
 0x1c9   :  { %v1998_v53 = vsel %vm2449_vm15, %v263_v47, %v264_v48  ;;  %v289_v54 = vrot.slane %v1983_v41, 6  ;;  %v291_v55 = vrot.slane %v1976_v38, 6  ;;  %v311_v56 = vrot.slane %v1976_v38, 1 }
 0x1ca   :  { %v282_v57 = vsel %vm2448_vm1, %v279_v49, %v281_v50  ;;  %v310_v58 = vsel %vm305_vm8, %v307_v22, %v309_v51  ;;  %v331_v59 = vrot.slane %v1976_v38, 3  ;;  %v319_v61 = vrot.slane %v1983_v41, 2  ;;  %v2079_v50 = vld [vmem:[#allocation2 + $0x50] sm:$0xff] }
 0x1cb   :  { %418 = vrot.lane.b32.xlu1 %v284_v52, %s1811_s20  ;;  %433 = vrot.lane.b32.xlu0 %v288_v40, %s1818_s4  ;;  %v2009_v60 = vsel %vm2447_vm2, %v289_v54, %v291_v55  ;;  %v268_v62 = vrot.slane %v1976_v38, 4  ;;  %v299_v63 = vrot.slane %v1983_v41, 7  ;;  %v321_v0 = vrot.slane %v1976_v38, 2  ;;  %v40_v52 = vld [vmem:[#allocation2 + $0x60] sm:$0xff]  ;;  %v2093_v55 = vld [vmem:[#allocation2 + $0x70] sm:$0xff] }
 0x1cc   :  { %v301_v1 = vrot.slane %v1976_v38, 7  ;;  %v329_v2 = vrot.slane %v1983_v41, 3  ;;  %v2018_v3 = vsel %vm2448_vm1, %v277_v14, %v279_v49  ;;  %v294_v4 = vsel %vm2447_vm2, 0.0, %v286_v29  ;;  %v2077_v49 = vld [vmem:[#allocation2 + $0x48] sm:$0xff] }
 0x1cd   :  { %v2022_v11 = vsel %vm2446_vm3, %v317_v35, %v319_v61  ;;  %v2025_v12 = vsel %vm2447_vm2, %v287_v18, %v289_v54  ;;  %v266_v22 = vrot.slane %v1983_v41, 4  ;;  %v2037_v29 = vsel %vm295_vm6, %v297_v19, %v299_v63 }
 0x1ce   :  { %v2031_v24 = vsel %vm295_vm6, %v299_v63, %v301_v1  ;;  %v2034_v14 = vsel %vm2445_vm4, %v327_v37, %v329_v2  ;;  %v2045_v18 = vsel %vm2445_vm4, %v329_v2, %v331_v59  ;;  %v2048_v33 = vsel %vm305_vm8, %v309_v51, %v311_v56  ;;  %v2061_v37 = vld [vmem:[#allocation2 + $0x28] sm:$0xff]  ;;  %v39_v51 = vld [vmem:[#allocation2 + $0x58] sm:$0xff] }
 0x1cf   :  { %431 = vrot.lane.b32.xlu1 %v294_v4, %s1818_s4  ;;  %446 = vrot.lane.b32.xlu0 %v298_v42, %s1819_s5  ;;  %v2040_v32 = vsel %vm2449_vm15, %v264_v48, %v266_v22  ;;  %v2053_v35 = vsel %vm2449_vm15, %v266_v22, %v268_v62  ;;  %v2056_v36 = vsel %vm2446_vm3, %v319_v61, %v321_v0  ;;  %v304_v19 = vsel %vm295_vm6, 0.0, %v296_v31  ;;  %v2067_v42 = vld [vmem:[#allocation2 + $0x38] sm:$0xff]  ;;  %v2069_v48 = vld [vmem:[#allocation2 + $0x40] sm:$0xff] }
 0x1d0   :  { %v1611_v40 = vpack.c.bf16 %v2063_v39, %v2061_v37  ;;  %v1615_v31 = vpack.c.bf16 %v2069_v48, %v2067_v42  ;;  %v1623_v54 = vpack.c.bf16 %v40_v52, %v39_v51  ;;  %v324_v61 = vsel %vm2446_vm3, %v321_v0, 0.0  ;;  %v2098_v63 = vld [vmem:[#allocation2 + $0x78] sm:$0xff]  ;;  %v2113_v0 = vld [vmem:[#allocation2 + $0x88] sm:$0xff] }
 0x1d1   :  { %vm545_vm3 = vcmask 195584   ;;  %vm554_vm2 = vcmask 326656   ;;  %vm559_vm1 = vcmask 392192  }
 0x1d2   :  { %1612 = vmatprep.subr.bf16.mxu0 %v1611_v40 }
 0x1d3   :  { %444 = vrot.lane.b32.xlu1 %v304_v19, %s1819_s5  ;;  %469 = vrot.lane.b32.xlu0 %v308_v44, %s1820_s6  ;;  %v314_v44 = vsel %vm305_vm8, %v311_v56, 0.0 }
 0x1d4   :  { %1614 = vmatpush3.bf16.msra.mxu0 %v1611_v40 }
 0x1d5   :  { %1616 = vmatprep.subr.bf16.mxu0 %v1615_v31 }
 0x1d7   :  { %482 = vrot.lane.b32.xlu0 %v318_v45, %s1821_s7  ;;  %462 = vrot.lane.b32.xlu1 %v1976_v38, %s1817_s3  ;;  %v1619_v45 = vpack.c.bf16 %v2079_v50, %v2077_v49  ;;  %v1700_v38 = vpack.i.bf16 %v1889_v17, %v1887_v16  ;;  %v1725_v16 = vpack.i.bf16 %v40_v52, %v39_v51  ;;  %v527_v17 = vpop.permute.xlu1 %526 }
 0x1d8   :  { %1618 = vmatpush3.bf16.msra.mxu0 %v1615_v31 }
 0x1d9   :  { %1620 = vmatprep.subr.bf16.mxu0 %v1619_v45 }
 0x1db   :  { %495 = vrot.lane.b32.xlu0 %v328_v46, %s1822_s8  ;;  %475 = vrot.lane.b32.xlu1 %v314_v44, %s1820_s6  ;;  %v2091_v46 = vld [vmem:[#allocation2 + $0x68] sm:$0xff] }
 0x1dc   :  { %1622 = vmatpush3.bf16.msra.mxu0 %v1619_v45  ;;  %v1627_v56 = vpack.c.bf16 %v2093_v55, %v2091_v46 }
 0x1dd   :  { %1624 = vmatprep.subr.bf16.mxu0 %v1623_v54 }
 0x1df   :  { %508 = vrot.lane.b32.xlu0 %v1998_v53, %s1823_s9  ;;  %424 = vrot.lane.b32.xlu1 %v282_v57, %s1811_s20  ;;  %v2100_v57 = vld [vmem:[#allocation2 + $0x80] sm:$0xff] }
 0x1e0   :  { %1626 = vmatpush3.bf16.msra.mxu0 %v1623_v54 }
 0x1e1   :  { %1628 = vmatprep.subr.bf16.mxu0 %v1627_v56 }
 0x1e3   :  { %460 = vrot.lane.b32.xlu0 %v1983_v41, %s1817_s3  ;;  %471 = vrot.lane.b32.xlu1 %v310_v58, %s1820_s6  ;;  %v1631_v41 = vpack.c.bf16 %v2100_v57, %v2098_v63  ;;  %v334_v58 = vsel %vm2445_vm4, %v331_v59, 0.0  ;;  %v1705_v59 = vpack.i.bf16 %v1896_v21, %v1894_v20  ;;  %vm540_vm4 = vcmask 130048  }
 0x1e4   :  { %1630 = vmatpush3.bf16.msra.mxu0 %v1627_v56 }
 0x1e5   :  { %1632 = vmatprep.subr.bf16.mxu0 %v1631_v41 }
 0x1e7   :  { %488 = vrot.lane.b32.xlu0 %v324_v61, %s1821_s7  ;;  %437 = vrot.lane.b32.xlu1 %v2009_v60, %s1818_s4  ;;  %v336_v60 = vsel %vm2449_vm15, %v268_v62, 0.0 }
 0x1e8   :  { %1634 = vmatpush3.bf16.msra.mxu0 %v1631_v41 }
 0x1e9   :  { %1535 = vmatprep.subr.mxu0 %v2113_v0 }
 0x1eb   :  { %501 = vrot.lane.b32.xlu0 %v334_v58, %s1822_s8  ;;  %484 = vrot.lane.b32.xlu1 %v2022_v11, %s1821_s7 }
 0x1ec   :  { %1536 = vmatpush3.msra.mxu0 %v2113_v0 }
 0x1ef   :  { %514 = vrot.lane.b32.xlu0 %v336_v60, %s1823_s9  ;;  %450 = vrot.lane.b32.xlu1 %v2031_v24, %s1819_s5 }
 0x1f3   :  { %497 = vrot.lane.b32.xlu1 %v2034_v14, %s1822_s8  ;;  %422 = vrot.lane.b32.xlu0 %v2018_v3, %s1811_s20 }
 0x1f7   :  { %435 = vrot.lane.b32.xlu0 %v2025_v12, %s1818_s4  ;;  %510 = vrot.lane.b32.xlu1 %v2040_v32, %s1823_s9 }
 0x1fb   :  { %448 = vrot.lane.b32.xlu0 %v2037_v29, %s1819_s5  ;;  %499 = vrot.lane.b32.xlu1 %v2045_v18, %s1822_s8 }
 0x1ff   :  { %473 = vrot.lane.b32.xlu0 %v2048_v33, %s1820_s6  ;;  %512 = vrot.lane.b32.xlu1 %v2053_v35, %s1823_s9 }
 0x203   :  { %486 = vrot.lane.b32.xlu0 %v2056_v36, %s1821_s7  ;;  %528 = vrot.lane.b32.xlu1 %v1955_v9, %s1816_s0  ;;  %v1715_v9 = vpack.i.bf16 %v2069_v48, %v2067_v42 }
 0x207   :  { %530 = vrot.lane.b32.xlu0 %v1953_v8, %s1816_s0  ;;  %1701 = vrot.lane.b32.xlu1 %v1700_v38, %s1824_s10  ;;  %v525_v8 = vpop.permute.xlu0 %524 }
 0x20b   :  { %1706 = vrot.lane.b32.xlu0 %v1705_v59, %s1824_s10  ;;  %583 = vrot.lane.b32.xlu1 %v1871_v7, %s1823_s9  ;;  %v274_v7 = vsel %vm2449_vm15, 0.0, %v263_v47  ;;  %vm2456_vm15 = vcmask 457728  }
 0x20f   :  { %1716 = vrot.lane.b32.xlu1 %v1715_v9, %s1814_s28 }
 0x213   :  { %1726 = vrot.lane.b32.xlu1 %v1725_v16, %s1814_s28 }
 0x235   :  { %v459_v62 = vpop.permute.xlu1 %458 }
 0x239   :  { %v457_v1 = vpop.permute.xlu1 %456  ;;  %v421_v2 = vpop.permute.xlu0 %420 }
 0x23a   :  { %v537_v58 = vsel %vm62_vm0, %v1998_v53, %v421_v2 }
 0x23d   :  { %v419_v3 = vpop.permute.xlu1 %418  ;;  %v434_v20 = vpop.permute.xlu0 %433 }
 0x23e   :  { %v536_v11 = vsel %vm62_vm0, %v274_v7, %v419_v3  ;;  %v542_v59 = vsel %vm540_vm4, %v537_v58, %v434_v20 }
 0x241   :  { %v432_v21 = vpop.permute.xlu1 %431  ;;  %v447_v4 = vpop.permute.xlu0 %446 }
 0x242   :  { %v541_v24 = vsel %vm540_vm4, %v536_v11, %v432_v21  ;;  %v547_v9 = vsel %vm545_vm3, %v542_v59, %v447_v4 }
 0x245   :  { %v445_v12 = vpop.permute.xlu1 %444  ;;  %v470_v22 = vpop.permute.xlu0 %469 }
 0x246   :  { %v546_v14 = vsel %vm545_vm3, %v541_v24, %v445_v12 }
 0x247   :  { %v550_v33 = vsel %vm160_vm5, %v546_v14, %v457_v1 }
 0x248   :  { %v555_v36 = vsel %vm554_vm2, %v550_v33, %v470_v22 }
 0x249   :  { %v483_v29 = vpop.permute.xlu0 %482  ;;  %v463_v18 = vpop.permute.xlu1 %462 }
 0x24a   :  { %v560_v19 = vsel %vm559_vm1, %v555_v36, %v483_v29 }
 0x24d   :  { %v496_v13 = vpop.permute.xlu0 %495  ;;  %v476_v47 = vpop.permute.xlu1 %475 }
 0x24e   :  { %v565_v40 = vsel %vm2456_vm15, %v560_v19, %v496_v13 }
 0x251   :  { %v509_v42 = vpop.permute.xlu0 %508  ;;  %v425_v48 = vpop.permute.xlu1 %424 }
 0x252   :  { %v570_v31 = vsel %vm2455_vm11, %v565_v40, %v509_v42  ;;  %v539_v3 = vsel %vm62_vm0, %v2053_v35, %v425_v48 }
 0x253   :  { %v575_v44 = vsel %vm2454_vm13, %v570_v31, %v525_v8 }
 0x254   :  { %v579_v45 = vmul.f32 %v575_v44, %v1869_v6  ;;  %v551_v6 = vsel %vm160_vm5, %v547_v9, %v459_v62 }
 0x255   :  { %v461_v51 = vpop.permute.xlu0 %460  ;;  %v472_v52 = vpop.permute.xlu1 %471 }
 0x256   :  { %1537 = vmatprep.mubr.msk.f32.mxu0 %vm2453_vm12, %v579_v45  ;;  %v556_v1 = vsel %vm554_vm2, %v551_v6, %v472_v52  ;;  %v1720_v6 = vpack.i.bf16 %v2079_v50, %v2077_v49 }
 0x259   :  { %v489_v54 = vpop.permute.xlu0 %488  ;;  %v438_v56 = vpop.permute.xlu1 %437 }
 0x25a   :  { %v544_v7 = vsel %vm540_vm4, %v539_v3, %v438_v56 }
 0x25d   :  { %v502_v61 = vpop.permute.xlu0 %501  ;;  %v485_v41 = vpop.permute.xlu1 %484 }
 0x25e   :  { %v561_v21 = vsel %vm559_vm1, %v556_v1, %v485_v41 }
 0x261   :  { %v515_v60 = vpop.permute.xlu0 %514  ;;  %v451_v38 = vpop.permute.xlu1 %450 }
 0x262   :  { %v549_v20 = vsel %vm545_vm3, %v544_v7, %v451_v38 }
 0x263   :  { %v553_v22 = vsel %vm160_vm5, %v549_v20, %v463_v18 }
 0x264   :  { %v558_v29 = vsel %vm554_vm2, %v553_v22, %v476_v47 }
 0x265   :  { %v498_v16 = vpop.permute.xlu1 %497  ;;  %v423_v8 = vpop.permute.xlu0 %422 }
 0x266   :  { %v566_v53 = vsel %vm2456_vm15, %v561_v21, %v498_v16  ;;  %v538_v14 = vsel %vm62_vm0, %v2040_v32, %v423_v8  ;;  %v1710_v8 = vpack.i.bf16 %v2063_v39, %v2061_v37 }
 0x268   :  { %1711 = vrot.lane.b32.xlu0 %v1710_v8, %s1814_s28 }
 0x269   :  { %v436_v2 = vpop.permute.xlu0 %435  ;;  %v511_v11 = vpop.permute.xlu1 %510 }
 0x26a   :  { %v571_v4 = vsel %vm2455_vm11, %v566_v53, %v511_v11  ;;  %v543_v33 = vsel %vm540_vm4, %v538_v14, %v436_v2 }
 0x26b   :  { %v576_v12 = vsel %vm2454_vm13, %v571_v4, %v527_v17  ;;  %v563_v17 = vsel %vm559_vm1, %v558_v29, %v489_v54 }
 0x26c   :  { %v580_v62 = vmul.f32 %v576_v12, %v1866_v5  ;;  %v568_v32 = vsel %vm2456_vm15, %v563_v17, %v502_v61  ;;  %1721 = vrot.lane.b32.xlu0 %v1720_v6, %s1814_s28 }
 0x26d   :  { %v449_v24 = vpop.permute.xlu0 %448  ;;  %v500_v35 = vpop.permute.xlu1 %499  ;;  %v573_v52 = vsel %vm2455_vm11, %v568_v32, %v515_v60 }
 0x26e   :  { %1538 = vmatmul.mubr.msk.f32.vlgmr.msra.gmra.mrb[4].mxu0 %vm2453_vm12, %v580_v62  ;;  %v548_v36 = vsel %vm545_vm3, %v543_v33, %v449_v24 }
 0x26f   :  { %v552_v5 = vsel %vm160_vm5, %v548_v36, %v461_v51 }
 0x271   :  { %v474_v13 = vpop.permute.xlu0 %473  ;;  %v513_v19 = vpop.permute.xlu1 %512 }
 0x272   :  { %v557_v18 = vsel %vm554_vm2, %v552_v5, %v474_v13 }
 0x275   :  { %v487_v40 = vpop.permute.xlu0 %486  ;;  %v529_v42 = vpop.permute.xlu1 %528 }
 0x276   :  { %v562_v48 = vsel %vm559_vm1, %v557_v18, %v487_v40 }
 0x277   :  { %v567_v47 = vsel %vm2456_vm15, %v562_v48, %v500_v35 }
 0x278   :  { %v572_v31 = vsel %vm2455_vm11, %v567_v47, %v513_v19 }
 0x279   :  { %v577_v44 = vsel %vm2454_vm13, %v572_v31, %v529_v42  ;;  %v531_v45 = vpop.permute.xlu0 %530  ;;  %v1702_v54 = vpop.permute.xlu1 %1701 }
 0x27a   :  { %v581_v51 = vmul.f32 %v577_v44, %v1877_v10  ;;  %v578_v56 = vsel %vm2454_vm13, %v573_v52, %v531_v45  ;;  %v1704_v41 = vunpack.i.h.bf16 %v1702_v54  ;;  %v1703_v58 = vunpack.i.l.bf16 %v1702_v54 }
 0x27b   :  { %v582_v38 = vmul.f32 %v578_v56, %v1885_v15  ;;  %v1730_v10 = vpack.i.bf16 %v2093_v55, %v2091_v46  ;;  %v1735_v15 = vpack.i.bf16 %v2100_v57, %v2098_v63  ;;  %vm2474_vm13 = vcmask 1044480  }
 0x27c   :  { %1540 = vmatprep.mubr.msk.f32.mxu0 %vm2453_vm12, %v581_v51  ;;  %v1635_v61 = vpack.c.bf16 %v1704_v41, %v1703_v58  ;;  %vm2476_vm15 = vmmov %vm2474_vm13 }
 0x27d   :  { %1541 = vmatmul.mubr.msk.f32.gmra.mrb[6].mxu0 %vm2453_vm12, %v582_v38  ;;  %v1707_v59 = vpop.permute.xlu0 %1706  ;;  %1731 = vrot.lane.b32.xlu1 %v1730_v10, %s1814_s28  ;;  %v584_v46 = vpop.permute.xlu1 %583  ;;  %vm2460_vm12 = vcmp.eq.s32.totalorder %v1922_v43, 1 }
 0x27e   :  { %v1709_v9 = vunpack.i.h.bf16 %v1707_v59  ;;  %v1708_v16 = vunpack.i.l.bf16 %v1707_v59  ;;  %1636 = vmatprep.subr.bf16.mxu1 %v1635_v61 }
 0x27f   :  { %1638 = vmatpush3.bf16.msra.mxu1 %v1635_v61 }
 0x280   :  { %v1639_v60 = vpack.c.bf16 %v1709_v9, %v1708_v16 }
 0x281   :  { %1736 = vrot.lane.b32.xlu1 %v1735_v15, %s1814_s28  ;;  %v1717_v21 = vpop.permute.xlu1 %1716 }
 0x282   :  { %1640 = vmatprep.subr.bf16.mxu1 %v1639_v60  ;;  %v1719_v49 = vunpack.i.h.bf16 %v1717_v21  ;;  %v1718_v50 = vunpack.i.l.bf16 %v1717_v21 }
 0x283   :  { %1642 = vmatpush3.bf16.msra.mxu1 %v1639_v60 }
 0x284   :  { %v1647_v36 = vpack.c.bf16 %v1719_v49, %v1718_v50 }
 0x285   :  { %1109 = vrot.lane.b32.xlu1 %v2113_v0, %s1814_s28  ;;  %v1727_v35 = vpop.permute.xlu1 %1726 }
 0x286   :  { %v1729_v48 = vunpack.i.h.bf16 %v1727_v35  ;;  %v1728_v32 = vunpack.i.l.bf16 %v1727_v35 }
 0x288   :  { %v1655_v54 = vpack.c.bf16 %v1729_v48, %v1728_v32 }
 0x2da   :  { %v1712_v2 = vpop.permute.xlu0 %1711 }
 0x2db   :  { %v1714_v12 = vunpack.i.h.bf16 %v1712_v2  ;;  %v1713_v14 = vunpack.i.l.bf16 %v1712_v2 }
 0x2dd   :  { %v1643_v13 = vpack.c.bf16 %v1714_v12, %v1713_v14 }
 0x2de   :  { %v1722_v19 = vpop.permute.xlu0 %1721 }
 0x2df   :  { %v1724_v5 = vunpack.i.h.bf16 %v1722_v19  ;;  %v1723_v18 = vunpack.i.l.bf16 %v1722_v19  ;;  %1644 = vmatprep.subr.bf16.mxu1 %v1643_v13 }
 0x2e1   :  { %v1651_v40 = vpack.c.bf16 %v1724_v5, %v1723_v18 }
 0x2ef   :  { %v1732_v26 = vpop.permute.xlu1 %1731 }
 0x2f0   :  { %v1734_v44 = vunpack.i.h.bf16 %v1732_v26  ;;  %v1733_v45 = vunpack.i.l.bf16 %v1732_v26 }
 0x2f2   :  { %v1659_v61 = vpack.c.bf16 %v1734_v44, %v1733_v45 }
 0x2f3   :  { %v1737_v58 = vpop.permute.xlu1 %1736 }
 0x2f4   :  { %v1739_v59 = vunpack.i.h.bf16 %v1737_v58  ;;  %v1738_v9 = vunpack.i.l.bf16 %v1737_v58 }
 0x341   :  { %v1539_v55 = vpop.f32.mrb[4].mxu0 }
 0x342   :  { %v671_v1 = vadd.f32 %v1539_v55, %v584_v46  ;;  %v665_v3 = vpop.f32.mrb[5].mxu0 }
 0x343   :  { %v666_v63 = vadd.f32 %v665_v3, %v584_v46 }
 0x344   :  { %v2221_v57 = vmax.f32 %v671_v1, 0.0 }
 0x345   :  { %v684_v7 = vmax.f32 %v666_v63, 0.0 }
 0x346   :  { %v886_v0 = vrot.slane %v2221_v57, 1  ;;  %v874_v37 = vrot.slane %v2221_v57, 7 }
 0x347   :  { %1551 = vmatprep.mubr.msk.f32.mxu1 %vm160_vm5, %v684_v7  ;;  %v873_v39 = vrot.slane %v684_v7, 7  ;;  %v885_v53 = vrot.slane %v684_v7, 1 }
 0x348   :  { %1552 = vmatmul.mubr.msk.f32.vlgmr.msra.gmra.mrb[4].mxu1 %vm160_vm5, %v2221_v57 }
 0x349   :  { %v884_v11 = vsel %vm295_vm6, 0.0, %v873_v39  ;;  %v887_v20 = vsel %vm305_vm8, %v885_v53, %v886_v0  ;;  %v875_v4 = vsel %vm295_vm6, %v873_v39, %v874_v37  ;;  %1646 = vmatpush3.bf16.msra.mxu1 %v1643_v13 }
 0x34a   :  { %v897_v62 = vsel %vm381_vm10, %v884_v11, %v684_v7  ;;  %v905_v22 = vsel %vm405_vm9, %v887_v20, %v684_v7  ;;  %v898_v24 = vsel %vm382_vm7, %v875_v4, %v2221_v57  ;;  %1648 = vmatprep.subr.bf16.mxu1 %v1647_v36  ;;  %vm2457_vm7 = vcmp.eq.s32.totalorder %v1908_v28, 1 }
 0x34b   :  { %v901_v29 = vmax.f32 %v684_v7, %v897_v62  ;;  %v902_v33 = vmax.f32 %v2221_v57, %v898_v24  ;;  %vm2458_vm9 = vcmp.eq.s32.totalorder %v1912_v34, 1  ;;  %vm2459_vm10 = vcmp.eq.s32.totalorder %v1910_v30, 1  ;;  %v1110_v30 = vpop.permute.xlu1 %1109 }
 0x34c   :  { %v1663_v28 = vpack.c.bf16 %v1739_v59, %v1738_v9 }
 0x34d   :  { %v909_v17 = vmax.f32 %v901_v29, %v905_v22  ;;  %1650 = vmatpush3.bf16.msra.mxu1 %v1647_v36 }
 0x34e   :  { %1652 = vmatprep.subr.bf16.mxu1 %v1651_v40 }
 0x34f   :  { %1020 = vrot.lane.b32.xlu1 %v909_v17, %s1816_s0 }
 0x350   :  { %v1542_v25 = vpop.f32.mrb[6].mxu0 }
 0x351   :  { %v681_v23 = vadd.f32 %v1542_v25, %v584_v46  ;;  %v675_v42 = vpop.f32.mrb[7].mxu0  ;;  %1654 = vmatpush3.bf16.msra.mxu1 %v1651_v40 }
 0x352   :  { %v676_v47 = vadd.f32 %v675_v42, %v584_v46  ;;  %1656 = vmatprep.subr.bf16.mxu1 %v1655_v54 }
 0x353   :  { %v687_v31 = vmax.f32 %v681_v23, 0.0 }
 0x354   :  { %v686_v52 = vmax.f32 %v676_v47, 0.0 }
 0x355   :  { %v890_v51 = vrot.slane %v687_v31, 1  ;;  %v878_v56 = vrot.slane %v687_v31, 7  ;;  %1658 = vmatpush3.bf16.msra.mxu1 %v1655_v54 }
 0x356   :  { %1554 = vmatprep.mubr.msk.f32.mxu1 %vm160_vm5, %v686_v52  ;;  %v888_v41 = vrot.slane %v686_v52, 1  ;;  %v876_v38 = vrot.slane %v686_v52, 7  ;;  %1660 = vmatprep.subr.bf16.mxu1 %v1659_v61 }
 0x357   :  { %1555 = vmatmul.mubr.msk.f32.gmra.mrb[6].mxu1 %vm160_vm5, %v687_v31  ;;  %v896_v16 = vsel %vm305_vm8, %v890_v51, 0.0 }
 0x358   :  { %v889_v60 = vsel %vm305_vm8, %v886_v0, %v888_v41  ;;  %v877_v10 = vsel %vm295_vm6, %v874_v37, %v876_v38  ;;  %v891_v15 = vsel %vm305_vm8, %v888_v41, %v890_v51  ;;  %v879_v8 = vsel %vm295_vm6, %v876_v38, %v878_v56 }
 0x359   :  { %v906_v6 = vsel %vm406_vm14, %v889_v60, %v2221_v57  ;;  %v899_v46 = vsel %vm2457_vm7, %v877_v10, %v686_v52  ;;  %v907_v55 = vsel %vm2458_vm9, %v891_v15, %v686_v52  ;;  %v900_v1 = vsel %vm2459_vm10, %v879_v8, %v687_v31  ;;  %1662 = vmatpush3.bf16.msra.mxu1 %v1659_v61 }
 0x35a   :  { %v910_v3 = vmax.f32 %v902_v33, %v906_v6  ;;  %v903_v63 = vmax.f32 %v686_v52, %v899_v46  ;;  %v904_v21 = vmax.f32 %v687_v31, %v900_v1  ;;  %v908_v7 = vsel %vm2460_vm12, %v896_v16, %v687_v31  ;;  %1664 = vmatprep.subr.bf16.mxu1 %v1663_v28 }
 0x35b   :  { %vm2461_vm12 = vcmask 1042432   ;;  %vm2463_vm7 = vcmask 1041408   ;;  %vm2464_vm9 = vcmask 1045504   ;;  %vm2465_vm10 = vcmask 1044480  }
 0x35c   :  { %1022 = vrot.lane.b32.xlu0 %v910_v3, %s1816_s0  ;;  %v2259_v27 = vmax.f32 %v903_v63, %v907_v55  ;;  %v2261_v57 = vmax.f32 %v904_v21, %v908_v7  ;;  %vm2462_vm14 = vmmov %vm2461_vm12 }
 0x35d   :  { %1666 = vmatpush3.bf16.msra.mxu1 %v1663_v28  ;;  %v2353_v28 = vld [vmem:[#allocation2 + $0x8] sm:$0xff] }
 0x35e   :  { %1581 = vmatprep.subr.mxu1 %v1110_v30 }
 0x361   :  { %1582 = vmatpush3.msra.mxu1 %v1110_v30  ;;  %v2355_v30 = vld [vmem:[#allocation2 + $0x10] sm:$0xff] }
 0x41b   :  { %v2263_v34 = vpop.f32.mrb[4].mxu1 }
 0x41c   :  { %954 = vrot.lane.b32.xlu1 %v2263_v34, %s1817_s3  ;;  %v2267_v43 = vpop.f32.mrb[5].mxu1  ;;  %v818_v0 = vrot.slane %v2263_v34, 5  ;;  %v827_v37 = vrot.slane %v2263_v34, 6  ;;  %v854_v39 = vrot.slane %v2263_v34, 2  ;;  %v836_v53 = vrot.slane %v2263_v34, 7 }
 0x41d   :  { %v817_v49 = vrot.slane %v2267_v43, 5  ;;  %v826_v50 = vrot.slane %v2267_v43, 6  ;;  %v835_v2 = vrot.slane %v2267_v43, 7  ;;  %v853_v11 = vrot.slane %v2267_v43, 2 }
 0x41e   :  { %v862_v20 = vrot.slane %v2267_v43, 3  ;;  %v863_v4 = vrot.slane %v2263_v34, 3  ;;  %v844_v12 = vrot.slane %v2267_v43, 1  ;;  %v845_v62 = vrot.slane %v2263_v34, 1 }
 0x41f   :  { %v825_v22 = vsel %vm2461_vm12, 0.0, %v817_v49  ;;  %v819_v24 = vsel %vm2462_vm14, %v817_v49, %v818_v0  ;;  %v828_v35 = vsel %vm2463_vm7, %v826_v50, %v827_v37  ;;  %v855_v14 = vsel %vm2464_vm9, %v853_v11, %v854_v39  ;;  %vm2466_vm12 = vmmov %vm2463_vm7  ;;  %v2371_v49 = vpop.permute.xlu0 %1022 }
 0x420   :  { %952 = vrot.lane.b32.xlu1 %v2267_v43, %s1817_s3  ;;  %914 = vrot.lane.b32.xlu0 %v825_v22, %s1811_s20  ;;  %v837_v29 = vsel %vm295_vm6, %v835_v2, %v836_v53  ;;  %v805_v33 = vrot.slane %v2267_v43, 4  ;;  %v864_v36 = vsel %vm2465_vm10, %v862_v20, %v863_v4  ;;  %v846_v13 = vsel %vm305_vm8, %v844_v12, %v845_v62 }
 0x421   :  { %v806_v19 = vrot.slane %v2263_v34, 4  ;;  %v834_v17 = vsel %vm2466_vm12, 0.0, %v826_v50  ;;  %vm2467_vm14 = vcmask 1043456   ;;  %v843_v18 = vsel %vm295_vm6, 0.0, %v835_v2 }
 0x422   :  { %vm2468_vm9 = vcmask 1042432   ;;  %vm2470_vm12 = vcmask 1045504   ;;  %v1740_v34 = vpack.i.bf16 %v2355_v30, %v2353_v28 }
 0x423   :  { %v2297_v5 = vsel %vm2467_vm14, %v805_v33, %v806_v19  ;;  %vm2469_vm10 = vmmov %vm2468_vm9 }
 0x424   :  { %927 = vrot.lane.b32.xlu1 %v834_v17, %s1818_s4  ;;  %916 = vrot.lane.b32.xlu0 %v819_v24, %s1811_s20  ;;  %vm2471_vm14 = vmmov %vm2463_vm7 }
 0x428   :  { %940 = vrot.lane.b32.xlu1 %v843_v18, %s1819_s5  ;;  %929 = vrot.lane.b32.xlu0 %v828_v35, %s1818_s4 }
 0x42a   :  { %v1556_v25 = vpop.f32.mrb[6].mxu1 }
 0x42b   :  { %v792_v26 = vpop.f32.mrb[7].mxu1  ;;  %v849_v40 = vrot.slane %v1556_v25, 1  ;;  %v867_v47 = vrot.slane %v1556_v25, 3  ;;  %v858_v31 = vrot.slane %v1556_v25, 2  ;;  %v810_v44 = vrot.slane %v1556_v25, 4 }
 0x42c   :  { %978 = vrot.lane.b32.xlu1 %v855_v14, %s1821_s7  ;;  %942 = vrot.lane.b32.xlu0 %v837_v29, %s1819_s5  ;;  %v829_v23 = vrot.slane %v792_v26, 6  ;;  %v838_v42 = vrot.slane %v792_v26, 7  ;;  %v820_v48 = vrot.slane %v792_v26, 5  ;;  %v847_v32 = vrot.slane %v792_v26, 1 }
 0x42d   :  { %v822_v56 = vrot.slane %v1556_v25, 5  ;;  %v856_v41 = vrot.slane %v792_v26, 2  ;;  %v831_v38 = vrot.slane %v1556_v25, 6  ;;  %v808_v61 = vrot.slane %v792_v26, 4 }
 0x42e   :  { %v830_v45 = vsel %vm2463_vm7, %v827_v37, %v829_v23  ;;  %v839_v52 = vsel %vm295_vm6, %v836_v53, %v838_v42  ;;  %v821_v54 = vsel %vm2468_vm9, %v818_v0, %v820_v48  ;;  %v850_v51 = vsel %vm305_vm8, %v847_v32, %v849_v40  ;;  %vm2472_vm7 = vmmov %vm2470_vm12  ;;  %v1754_v0 = vld [vmem:[#allocation2] ss:$0 sm:$0xff]  ;;  %v1021_v53 = vpop.permute.xlu1 %1020 }
 0x42f   :  { %v848_v58 = vsel %vm305_vm8, %v845_v62, %v847_v32  ;;  %v840_v59 = vrot.slane %v1556_v25, 7  ;;  %v865_v9 = vrot.slane %v792_v26, 3  ;;  %v823_v16 = vsel %vm2469_vm10, %v820_v48, %v822_v56  ;;  %vm2477_vm10 = vmmov %vm2474_vm13  ;;  %v2367_v37 = vld [vmem:[#allocation2 + $0x20] sm:$0xff] }
 0x430   :  { %991 = vrot.lane.b32.xlu1 %v864_v36, %s1822_s8  ;;  %965 = vrot.lane.b32.xlu0 %v846_v13, %s1820_s6  ;;  %v859_v60 = vsel %vm2470_vm12, %v856_v41, %v858_v31  ;;  %v832_v10 = vsel %vm2471_vm14, %v829_v23, %v831_v38  ;;  %v857_v15 = vsel %vm2472_vm7, %v854_v39, %v856_v41  ;;  %vm2473_vm9 = vcmask 1043456   ;;  %v1757_v23 = vld [vmem:[#allocation2 + $0x90] sm:$0xff] }
 0x431   :  { %v2318_v8 = vsel %vm2473_vm9, %v808_v61, %v810_v44  ;;  %v841_v6 = vsel %vm295_vm6, %v838_v42, %v840_v59  ;;  %v866_v46 = vsel %vm2474_vm13, %v863_v4, %v865_v9  ;;  %vm2475_vm11 = vmmov %vm2473_vm9  ;;  %v868_v1 = vsel %vm2476_vm15, %v865_v9, %v867_v47 }
 0x432   :  { %v2323_v55 = vsel %vm2475_vm11, %v806_v19, %v808_v61  ;;  %v852_v3 = vsel %vm305_vm8, %v849_v40, 0.0  ;;  %v870_v63 = vsel %vm2477_vm10, %v867_v47, 0.0  ;;  %vm2478_vm6 = vmmov %vm2472_vm7  ;;  %vm2481_vm13 = vcmask 457728  }
 0x433   :  { %v861_v21 = vsel %vm2478_vm6, %v858_v31, 0.0  ;;  %vm2479_vm11 = vmmov %vm2473_vm9  ;;  %vm2482_vm15 = vcmask 523264   ;;  %vm2483_vm12 = vcmask 588800   ;;  %vm2484_vm14 = vcmask 850944  }
 0x434   :  { %1004 = vrot.lane.b32.xlu1 %v2297_v5, %s1823_s9  ;;  %958 = vrot.lane.b32.xlu0 %v1556_v25, %s1817_s3  ;;  %v872_v7 = vsel %vm2479_vm11, %v810_v44, 0.0  ;;  %vm2480_vm8 = vmmov %vm2473_vm9 }
 0x435   :  { %vm2489_vm9 = vmmov %vm2484_vm14 }
 0x438   :  { %971 = vrot.lane.b32.xlu0 %v852_v3, %s1820_s6  ;;  %956 = vrot.lane.b32.xlu1 %v792_v26, %s1817_s3 }
 0x43c   :  { %997 = vrot.lane.b32.xlu0 %v870_v63, %s1822_s8  ;;  %984 = vrot.lane.b32.xlu1 %v861_v21, %s1821_s7 }
 0x440   :  { %1010 = vrot.lane.b32.xlu0 %v872_v7, %s1823_s9  ;;  %931 = vrot.lane.b32.xlu1 %v830_v45, %s1818_s4 }
 0x444   :  { %944 = vrot.lane.b32.xlu1 %v839_v52, %s1819_s5  ;;  %918 = vrot.lane.b32.xlu0 %v821_v54, %s1811_s20 }
 0x448   :  { %969 = vrot.lane.b32.xlu1 %v850_v51, %s1820_s6  ;;  %920 = vrot.lane.b32.xlu0 %v823_v16, %s1811_s20 }
 0x44c   :  { %982 = vrot.lane.b32.xlu1 %v859_v60, %s1821_s7  ;;  %967 = vrot.lane.b32.xlu0 %v848_v58, %s1820_s6 }
 0x450   :  { %933 = vrot.lane.b32.xlu0 %v832_v10, %s1818_s4  ;;  %1008 = vrot.lane.b32.xlu1 %v2318_v8, %s1823_s9 }
 0x454   :  { %980 = vrot.lane.b32.xlu0 %v857_v15, %s1821_s7  ;;  %1024 = vrot.lane.b32.xlu1 %v2259_v27, %s1816_s0  ;;  %v2365_v27 = vld [vmem:[#allocation2 + $0x18] sm:$0xff] }
 0x455   :  { %v1745_v39 = vpack.i.bf16 %v2367_v37, %v2365_v27 }
 0x458   :  { %946 = vrot.lane.b32.xlu0 %v841_v6, %s1819_s5  ;;  %1741 = vrot.lane.b32.xlu1 %v1740_v34, %s1825_s11 }
 0x45c   :  { %993 = vrot.lane.b32.xlu0 %v866_v46, %s1822_s8  ;;  %1124 = vrot.lane.b32.xlu1 %v1754_v0, %s1817_s3 }
 0x460   :  { %1006 = vrot.lane.b32.xlu0 %v2323_v55, %s1823_s9 }
 0x464   :  { %995 = vrot.lane.b32.xlu0 %v868_v1, %s1822_s8 }
 0x468   :  { %1026 = vrot.lane.b32.xlu0 %v2261_v57, %s1816_s0  ;;  %v816_v57 = vsel %vm2480_vm8, 0.0, %v805_v33 }
 0x46c   :  { %1746 = vrot.lane.b32.xlu0 %v1745_v39, %s1825_s11 }
 0x48e   :  { %v955_v50 = vpop.permute.xlu1 %954 }
 0x492   :  { %v953_v2 = vpop.permute.xlu1 %952  ;;  %v915_v11 = vpop.permute.xlu0 %914 }
 0x493   :  { %v1032_v22 = vsel %vm62_vm0, %v816_v57, %v915_v11 }
 0x496   :  { %v928_v20 = vpop.permute.xlu1 %927  ;;  %v917_v4 = vpop.permute.xlu0 %916 }
 0x497   :  { %v1036_v24 = vsel %vm540_vm4, %v1032_v22, %v928_v20  ;;  %v1033_v60 = vsel %vm62_vm0, %v2297_v5, %v917_v4  ;;  %v1758_v22 = vld [vmem:[#allocation2 + $0x98] sm:$0xff] }
 0x49a   :  { %v941_v12 = vpop.permute.xlu1 %940  ;;  %v930_v62 = vpop.permute.xlu0 %929 }
 0x49b   :  { %v1040_v29 = vsel %vm545_vm3, %v1036_v24, %v941_v12  ;;  %v1037_v6 = vsel %vm540_vm4, %v1033_v60, %v930_v62 }
 0x49c   :  { %v1044_v13 = vsel %vm160_vm5, %v1040_v29, %v953_v2 }
 0x49e   :  { %v979_v35 = vpop.permute.xlu1 %978  ;;  %v943_v14 = vpop.permute.xlu0 %942 }
 0x49f   :  { %v1041_v1 = vsel %vm545_vm3, %v1037_v6, %v943_v14 }
 0x4a0   :  { %v1045_v7 = vsel %vm160_vm5, %v1041_v1, %v955_v50 }
 0x4a2   :  { %v992_v36 = vpop.permute.xlu1 %991  ;;  %v966_v19 = vpop.permute.xlu0 %965 }
 0x4a3   :  { %v1048_v17 = vsel %vm554_vm2, %v1044_v13, %v966_v19 }
 0x4a4   :  { %v1052_v18 = vsel %vm559_vm1, %v1048_v17, %v979_v35  ;;  %v1759_v17 = vld [vmem:[#allocation2 + $0xa0] sm:$0xff] }
 0x4a5   :  { %v1056_v43 = vsel %vm2481_vm13, %v1052_v18, %v992_v36 }
 0x4a6   :  { %v1005_v25 = vpop.permute.xlu1 %1004  ;;  %v959_v33 = vpop.permute.xlu0 %958 }
 0x4a7   :  { %v1060_v26 = vsel %vm2482_vm15, %v1056_v43, %v1005_v25 }
 0x4a8   :  { %v1064_v40 = vsel %vm2483_vm12, %v1060_v26, %v1021_v53  ;;  %v1760_v26 = vld [vmem:[#allocation2 + $0xa8] sm:$0xff] }
 0x4a9   :  { %v1068_v42 = vmul.f32 %v1757_v23, %v1064_v40 }
 0x4aa   :  { %v972_v48 = vpop.permute.xlu0 %971  ;;  %v957_v32 = vpop.permute.xlu1 %956 }
 0x4ab   :  { %1583 = vmatprep.mubr.msk.f32.mxu1 %vm2484_vm14, %v1068_v42 }
 0x4ae   :  { %v998_v47 = vpop.permute.xlu0 %997  ;;  %v985_v31 = vpop.permute.xlu1 %984 }
 0x4b2   :  { %v1011_v44 = vpop.permute.xlu0 %1010  ;;  %v932_v45 = vpop.permute.xlu1 %931 }
 0x4b6   :  { %v945_v52 = vpop.permute.xlu1 %944  ;;  %v919_v54 = vpop.permute.xlu0 %918 }
 0x4b7   :  { %v1034_v9 = vsel %vm62_vm0, %v2323_v55, %v919_v54 }
 0x4b8   :  { %v1038_v3 = vsel %vm540_vm4, %v1034_v9, %v932_v45 }
 0x4ba   :  { %v921_v51 = vpop.permute.xlu0 %920  ;;  %v970_v56 = vpop.permute.xlu1 %969 }
 0x4bb   :  { %v1035_v16 = vsel %vm62_vm0, %v2318_v8, %v921_v51  ;;  %v1042_v8 = vsel %vm545_vm3, %v1038_v3, %v945_v52  ;;  %vm2485_vm0 = vmmov %vm2481_vm13 }
 0x4bc   :  { %v1046_v39 = vsel %vm160_vm5, %v1042_v8, %v957_v32  ;;  %vm2488_vm7 = vmmov %vm2485_vm0 }
 0x4bd   :  { %v1050_v57 = vsel %vm554_vm2, %v1046_v39, %v970_v56  ;;  %vm2490_vm10 = vmmov %vm2485_vm0 }
 0x4be   :  { %v968_v41 = vpop.permute.xlu0 %967  ;;  %v983_v58 = vpop.permute.xlu1 %982 }
 0x4bf   :  { %v1049_v5 = vsel %vm554_vm2, %v1045_v7, %v968_v41  ;;  %v1054_v14 = vsel %vm559_vm1, %v1050_v57, %v983_v58 }
 0x4c2   :  { %v934_v38 = vpop.permute.xlu0 %933  ;;  %v1009_v59 = vpop.permute.xlu1 %1008 }
 0x4c3   :  { %v1039_v10 = vsel %vm540_vm4, %v1035_v16, %v934_v38  ;;  %vm2486_vm4 = vmmov %vm2482_vm15  ;;  %vm1361_vm15 = vcmask 212160  }
 0x4c4   :  { %vm2491_vm6 = vmmov %vm2486_vm4 }
 0x4c6   :  { %v981_v61 = vpop.permute.xlu0 %980  ;;  %v1025_v63 = vpop.permute.xlu1 %1024 }
 0x4c7   :  { %v1053_v34 = vsel %vm559_vm1, %v1049_v5, %v981_v61 }
 0x4ca   :  { %v947_v15 = vpop.permute.xlu0 %946  ;;  %v1742_v11 = vpop.permute.xlu1 %1741 }
 0x4cb   :  { %v1043_v46 = vsel %vm545_vm3, %v1039_v10, %v947_v15  ;;  %v1744_v4 = vunpack.i.h.bf16 %v1742_v11  ;;  %v1743_v12 = vunpack.i.l.bf16 %v1742_v11  ;;  %vm2487_vm3 = vmmov %vm2483_vm12  ;;  %v32_v15 = vld [vmem:[#allocation2 + $0x8] sm:$0x1] }
 0x4cc   :  { %v1047_v55 = vsel %vm160_vm5, %v1043_v46, %v959_v33  ;;  %vm2492_vm11 = vmmov %vm2487_vm3 }
 0x4cd   :  { %v1051_v0 = vsel %vm554_vm2, %v1047_v55, %v972_v48  ;;  %v1667_v35 = vpack.c.bf16 %v1744_v4, %v1743_v12  ;;  %vm2493_vm2 = vmmov %vm2486_vm4 }
 0x4ce   :  { %v994_v21 = vpop.permute.xlu0 %993  ;;  %v1055_v50 = vsel %vm559_vm1, %v1051_v0, %v985_v31  ;;  %vm2494_vm8 = vmmov %vm2487_vm3 }
 0x4cf   :  { %v1057_v53 = vsel %vm2485_vm0, %v1053_v34, %v994_v21  ;;  %v1059_v13 = vsel %vm2490_vm10, %v1055_v50, %v998_v47  ;;  %1668 = vmatprep.subr.bf16.mxu0 %v1667_v35  ;;  %vm2495_vm1 = vmmov %vm2489_vm9  ;;  %v1125_v47 = vpop.permute.xlu1 %1124 }
 0x4d0   :  { %1670 = vmatpush3.bf16.msra.mxu0 %v1667_v35  ;;  %v1063_v43 = vsel %vm2493_vm2, %v1059_v13, %v1011_v44  ;;  %vm2496_vm13 = vmmov %vm2495_vm1 }
 0x4d2   :  { %v1007_v2 = vpop.permute.xlu0 %1006 }
 0x4d3   :  { %v1061_v20 = vsel %vm2486_vm4, %v1057_v53, %v1007_v2 }
 0x4d4   :  { %v1065_v62 = vsel %vm2487_vm3, %v1061_v20, %v2371_v49 }
 0x4d5   :  { %v1069_v24 = vmul.f32 %v1758_v22, %v1065_v62 }
 0x4d6   :  { %v996_v29 = vpop.permute.xlu0 %995 }
 0x4d7   :  { %v1058_v36 = vsel %vm2488_vm7, %v1054_v14, %v996_v29  ;;  %1584 = vmatmul.mubr.msk.f32.vlgmr.msra.gmra.mrb[8].mxu1 %vm2489_vm9, %v1069_v24 }
 0x4d8   :  { %v1062_v19 = vsel %vm2491_vm6, %v1058_v36, %v1009_v59 }
 0x4d9   :  { %v1066_v49 = vsel %vm2492_vm11, %v1062_v19, %v1025_v63 }
 0x4da   :  { %v1070_v18 = vmul.f32 %v1759_v17, %v1066_v49  ;;  %v1027_v25 = vpop.permute.xlu0 %1026 }
 0x4db   :  { %v1067_v33 = vsel %vm2494_vm8, %v1063_v43, %v1027_v25 }
 0x4dc   :  { %v1071_v40 = vmul.f32 %v1760_v26, %v1067_v33  ;;  %1586 = vmatprep.mubr.msk.f32.mxu1 %vm2495_vm1, %v1070_v18 }
 0x4de   :  { %1587 = vmatmul.mubr.msk.f32.gmra.mrb[10].mxu1 %vm2496_vm13, %v1071_v40  ;;  %v1747_v23 = vpop.permute.xlu0 %1746 }
 0x4df   :  { %v1749_v42 = vunpack.i.h.bf16 %v1747_v23  ;;  %v1748_v48 = vunpack.i.l.bf16 %v1747_v23 }
 0x4e1   :  { %v1671_v32 = vpack.c.bf16 %v1749_v42, %v1748_v48 }
 0x4e3   :  { %1672 = vmatprep.subr.bf16.mxu0 %v1671_v32 }
 0x4e4   :  { %1674 = vmatpush3.bf16.msra.mxu0 %v1671_v32 }
 0x5aa   :  { %v1585_v31 = vpop.f32.mrb[8].mxu1 }
 0x5ab   :  { %v1211_v45 = vadd.f32 %v1585_v31, %v1125_v47  ;;  %v1205_v52 = vpop.f32.mrb[9].mxu1 }
 0x5ac   :  { %v1206_v44 = vadd.f32 %v1205_v52, %v1125_v47 }
 0x5ad   :  { %v1225_v51 = vmax.f32 %v1211_v45, 0.0 }
 0x5ae   :  { %v1224_v54 = vmax.f32 %v1206_v44, 0.0 }
 0x5b0   :  { %1597 = vmatprep.mubr.msk.f32.mxu0 %vm160_vm5, %v1224_v54 }
 0x5b1   :  { %v1588_v56 = vpop.f32.mrb[10].mxu1  ;;  %1598 = vmatmul.mubr.msk.f32.vlgmr.msra.gmra.mrb[8].mxu0 %vm160_vm5, %v1225_v51 }
 0x5b2   :  { %v1221_v41 = vadd.f32 %v1588_v56, %v1125_v47  ;;  %v1215_v58 = vpop.f32.mrb[11].mxu1 }
 0x5b3   :  { %v1216_v38 = vadd.f32 %v1215_v58, %v1125_v47 }
 0x5b4   :  { %v1227_v59 = vmax.f32 %v1221_v41, 0.0 }
 0x5b5   :  { %v1226_v61 = vmax.f32 %v1216_v38, 0.0 }
 0x5b7   :  { %1600 = vmatprep.mubr.msk.f32.mxu0 %vm160_vm5, %v1226_v61 }
 0x5b8   :  { %1601 = vmatmul.mubr.msk.f32.gmra.mrb[10].mxu0 %vm160_vm5, %v1227_v59  ;;  %vm1384_vm5 = vcmask 8192  }
 0x684   :  { %v1599_v9 = vpop.f32.mrb[8].mxu0 }
 0x685   :  { %1344 = vperm.xlu1 %1750, %v1599_v9   ;;  %v1318_v16 = vpop.f32.mrb[9].mxu0 }
 0x686   :  { %1339 = vperm.xlu0 %1751, %v1318_v16  }
 0x68b   :  { %v1602_v60 = vpop.f32.mrb[10].mxu0 }
 0x68c   :  { %1354 = vperm.xlu0 %1751, %v1602_v60   ;;  %v1328_v10 = vpop.f32.mrb[11].mxu0 }
 0x68d   :  { %1349 = vperm.xlu1 %1750, %v1328_v10  }
 0x691   :  { %1376 = vrot.lane.b32.xlu1 %v32_v15, %s1824_s10 }
 0x704   :  { %v1345_v6 = vpop.permute.xlu1 %1344 }
 0x705   :  { %v1340_v46 = vpop.permute.xlu0 %1339  ;;  %v1358_v1 = vmul.f32 %v2355_v30, %v1345_v6 }
 0x706   :  { %v1357_v3 = vmul.f32 %v2353_v28, %v1340_v46 }
 0x707   :  { %v1363_v63 = vsel %vm1361_vm15, %v1358_v1, 0.0 }
 0x708   :  { %v1362_v55 = vsel %vm1361_vm15, %v1357_v3, 0.0 }
 0x709   :  { %v1364_v34 = vadd.f32 %v1363_v63, %v1362_v55 }
 0x70b   :  { %v1355_v21 = vpop.permute.xlu0 %1354 }
 0x70c   :  { %v1350_v8 = vpop.permute.xlu1 %1349  ;;  %v1360_v7 = vmul.f32 %v2367_v37, %v1355_v21 }
 0x70d   :  { %v1359_v5 = vmul.f32 %v2365_v27, %v1350_v8 }
 0x70e   :  { %v1367_v53 = vsel %vm1361_vm15, %v1360_v7, 0.0 }
 0x70f   :  { %v1365_v0 = vsel %vm1361_vm15, %v1359_v5, 0.0 }
 0x710   :  { %v1366_v39 = vadd.f32 %v1365_v0, %v1364_v34  ;;  %v1377_v28 = vpop.permute.xlu1 %1376 }
 0x712   :  { %v1368_v2 = vadd.f32 %v1367_v53, %v1366_v39 }
 0x714   :  { %v1369_v11 = vrot.slane %v1368_v2, 4 }
 0x716   :  { %v1370_v20 = vadd.f32 %v1369_v11, %v1368_v2 }
 0x718   :  { %v1371_v4 = vrot.slane %v1370_v20, 2 }
 0x71a   :  { %v1372_v30 = vadd.f32 %v1371_v4, %v1370_v20 }
 0x71c   :  { %v1373_v12 = vrot.slane %v1372_v30, 1 }
 0x71e   :  { %v1374_v62 = vadd.f32 %v1373_v12, %v1372_v30 }
 0x720   :  { %v1379_v50 = vadd.f32 %v1377_v28, %v1374_v62 }
 0x722   :  { %1381 = vrot.lane.b32.xlu0 %v1379_v50, %s1826_s12 }
 0x794   :  { %v1382_v27 = vpop.permute.xlu0 %1381 }
 0x795   :  { %1385 = vst.msk [vmem:[#allocation5] sm:$0x1] %vm1384_vm5, %v1382_v27 }
 0x796   :  { %1794 = shalt.err (!%p1791_p12)
}
 0x797   :  { %s1795_s19 = scalar_lea.hbm %s2443_s2, 16 }
 0x798   :  { %p1796_p13 = scmp.ne.s32.totalorder %s2443_s2, %s1795_s19  ;;  %p1799_p0 = scmp.lt.u32.totalorder %s1795_s19, %s2443_s2 }
 0x79a   :  { %p1801_p1 = pnand %p1799_p0, %p1796_p13 }
 0x79c   :  { %1804 = shalt.err (!%p1801_p1)
}
 0x79d   :  { %1395 = dma.vmem_to_hbm [thread:$0]  %s1393_s14, 16, %s2443_s2, [#allocation4]  }
 0x79e   :  { %1807 = dma.done.wait [#allocation4], 16  }
 0x79f   :  { %1808 = vsyncadd [#allocation4], 4294967280 }
 0x7a0   :  { %1399 = vsyncpa [#allocation3], 1 }
 0x7a1   :  { %1400 = vsyncpa [#allocation4], 1 }

</bundles_post_ra>
